<compile_context>
chip_gen: v7x
topology: tpu7x:2x2x1
jax: 0.10.0
libtpu: 0.0.40
codegen_flags: <defaults>
</compile_context>

<pallas_src>
import functools
import numpy as np

import jax
import jax.numpy as jnp
from jax.experimental import pallas as pl
from jax.experimental.pallas import tpu as pltpu

LN_EPS = 1e-5
INV_SQRT2 = 0.7071067811865476


def _layer_norm(x, gamma, beta):
    mean = jnp.mean(x, axis=-1, keepdims=True)
    var = jnp.mean((x - mean) ** 2, axis=-1, keepdims=True)
    return (x - mean) * jax.lax.rsqrt(var + LN_EPS) * gamma + beta


# ---------------------------------------------------------------------------
# Fused kernel: one batch-block per grid step, all layers, whole model in VMEM.
# ---------------------------------------------------------------------------
def fused_transformer_kernel(
        x_ref, pos_ref,
        wqkv_ref, wp_ref, bp_ref,
        lng_ref, lnb_ref, w1_ref, b1_ref, w2_ref, b2_ref,
        lngf_ref, lnbf_ref, wpool_ref, bpool_ref, wfc_ref, bfc_ref,
        o_ref, *, num_layers, num_heads, dot_dtype):
    bb, N, C = x_ref.shape
    BN = bb * N
    hd = C // num_heads

    # Positional-embedding add (broadcast over batch); dropout = identity (eval).
    x = x_ref[...].astype(jnp.float32) + pos_ref[...].astype(jnp.float32)
    # Fold batch into the sublane dim; residual path stays f32 throughout.
    x = x.reshape(BN, C)

    for li in range(num_layers):
        # ---- multi-head self-attention (reference has NO pre-norm here) ----
        # Single full-width qkv matmul (scale already folded into Wq columns).
        qkv = jnp.dot(x.astype(dot_dtype), wqkv_ref[li],
                      preferred_element_type=jnp.float32)            # (BN, 3C)
        # TODO(synk): for large N, tile this flash-style (q-tile x kv-tile with
        # online softmax) instead of materializing the full (bb, N, N) scores.
        head_outs = []
        for h in range(num_heads):        # tiny static loop; 3-D batched einsums
            q3 = qkv[:, h * hd:(h + 1) * hd].reshape(bb, N, hd)
            k3 = qkv[:, C + h * hd:C + (h + 1) * hd].reshape(bb, N, hd)
            v3 = qkv[:, 2 * C + h * hd:2 * C + (h + 1) * hd].reshape(bb, N, hd)
            s = jnp.einsum('bqd,bkd->bqk',
                           q3.astype(dot_dtype), k3.astype(dot_dtype),
                           preferred_element_type=jnp.float32)       # (bb,N,N)
            s = s - jnp.max(s, axis=-1, keepdims=True)               # f32 softmax
            p = jnp.exp(s)
            p = p / jnp.sum(p, axis=-1, keepdims=True)               # exact div
            o3 = jnp.einsum('bqk,bkd->bqd',
                            p.astype(dot_dtype), v3.astype(dot_dtype),
                            preferred_element_type=jnp.float32)
            head_outs.append(o3.reshape(BN, hd))
        # head-major concat == torch (attn @ v).transpose(1,2).reshape(B,N,C)
        attn = jnp.concatenate(head_outs, axis=-1)                   # (BN, C)
        # single full-width output projection + residual (f32)
        x = x + jnp.dot(attn.astype(dot_dtype), wp_ref[li],
                        preferred_element_type=jnp.float32) + bp_ref[li]

        # ---- MLP block with pre-LayerNorm ----
        xn = _layer_norm(x, lng_ref[li], lnb_ref[li])
        h1 = jnp.dot(xn.astype(dot_dtype), w1_ref[li],
                     preferred_element_type=jnp.float32) + b1_ref[li]
        h1 = 0.5 * h1 * (1.0 + jax.lax.erf(h1 * INV_SQRT2))          # exact GELU
        x = x + jnp.dot(h1.astype(dot_dtype), w2_ref[li],
                        preferred_element_type=jnp.float32) + b2_ref[li]

    # ---- final LayerNorm + attention pooling + classifier ----
    xn = _layer_norm(x, lngf_ref[...], lnbf_ref[...])                # (BN, C)
    xn3 = xn.reshape(bb, N, C)
    scores = jnp.sum(xn3 * wpool_ref[...], axis=-1, keepdims=True) + bpool_ref[...]
    scores = scores - jnp.max(scores, axis=1, keepdims=True)         # softmax over seq
    w = jnp.exp(scores)
    w = w / jnp.sum(w, axis=1, keepdims=True)                        # (bb, N, 1)
    pooled = jnp.sum(w * xn3, axis=1)                                # (bb, C)
    out = jnp.dot(pooled.astype(dot_dtype), wfc_ref[...],
                  preferred_element_type=jnp.float32) + bfc_ref[...]  # (bb, Cpad)
    o_ref[...] = out.reshape(o_ref.shape).astype(o_ref.dtype)


# ---------------------------------------------------------------------------
# Wrapper
# ---------------------------------------------------------------------------
def transformer_forward(params, x, *, num_heads, num_classes,
                        batch_block=1, dot_dtype=jnp.bfloat16):
    B, N, C = x.shape
    assert B % batch_block == 0
    bb = batch_block
    num_layers = params["wqkv"].shape[0]
    mlp_size = params["w1"].shape[-1]
    ncls_pad = params["wfc"].shape[-1]

    kern = functools.partial(fused_transformer_kernel,
                             num_layers=num_layers, num_heads=num_heads,
                             dot_dtype=dot_dtype)

    def full_spec(arr):
        nd = arr.ndim

        def imap(b):
            return (0,) * nd

        return pl.BlockSpec(arr.shape, imap)

    # TODO(synk): for large configs (dim>=256, many layers) the (L, ...) weight
    # stacks should live in memory_space=pl.ANY and be double-buffered per layer
    # with pltpu.make_async_copy; at these sizes they comfortably fit VMEM.
    weight_keys = ("wqkv", "wp", "bp", "lng", "lnb", "w1", "b1", "w2", "b2",
                   "lng_f", "lnb_f", "wpool", "bpool", "wfc", "bfc")
    weight_args = [params[k] for k in weight_keys]

    in_specs = ([pl.BlockSpec((bb, N, C), lambda b: (b, 0, 0)),
                 full_spec(params["pos_emb"])]
                + [full_spec(w) for w in weight_args])
    out_specs = pl.BlockSpec((bb, 1, ncls_pad), lambda b: (b, 0, 0))

    # VMEM budget sized from actual bytes (weights resident + activation slabs).
    nbytes = lambda a: int(np.prod(a.shape)) * jnp.dtype(a.dtype).itemsize
    param_bytes = nbytes(params["pos_emb"]) + sum(nbytes(w) for w in weight_args)
    act_bytes = 4 * (bb * N * (8 * C + 2 * mlp_size)
                     + bb * num_heads * N * N * 3)
    vmem_limit = int(min(128 * 2 ** 20,
                         max(32 * 2 ** 20, 2 * param_bytes + 4 * act_bytes)))

    # TODO(synk): the F.pad branch for positional_embedding == 'none' is not
    # reachable with sine embeddings (and references an attribute the reference
    # module never defines), so it is not implemented.
    out = pl.pallas_call(
        kern,
        grid=(B // bb,),
        in_specs=in_specs,
        out_specs=out_specs,
        out_shape=jax.ShapeDtypeStruct((B, 1, ncls_pad), x.dtype),
        compiler_params=pltpu.CompilerParams(
            dimension_semantics=("parallel",),
            vmem_limit_bytes=vmem_limit),
    )(x, params["pos_emb"], *weight_args)
    return out[:, 0, :num_classes]


# ---------------------------------------------------------------------------
# Parameters
# ---------------------------------------------------------------------------
def sinusoidal_embedding(n_channels, dim):
    pe = np.array(
        [[p / 10000 ** (2 * (i // 2) / dim) for i in range(dim)]
         for p in range(n_channels)],
        dtype=np.float32,
    )
    pe[:, 0::2] = np.sin(pe[:, 0::2])
    pe[:, 1::2] = np.cos(pe[:, 1::2])
    return jnp.asarray(pe[None])                  # (1, N, dim)


def init_params(key, *, dim, num_layers, num_heads, mlp_size, num_classes,
                seq_len, dot_dtype=jnp.bfloat16):
    """Random params, pre-packed in kernel layout.

    Kernel layout (x @ W orientation):
      wqkv : (L, dim, 3*dim)  bf16 -- fused q|k|v columns in torch's
             reshape(B,N,3,H,hd) ordering; Wq columns pre-scaled by hd**-0.5.
      wp   : (L, dim, dim)    bf16 -- full output projection.
      w1/w2: bf16 MLP weights; biases / LayerNorm params / pooling in f32.
      wfc  : (dim, ncls_pad)  bf16, zero-padded to a 128-lane-dense width.
    """
    hd = dim // num_heads
    scale = hd ** (-0.5)
    ncls_pad = ((num_classes + 127) // 128) * 128

    def nrm(k, shape, s=0.02):
        return (s * jax.random.normal(k, shape)).astype(jnp.float32)

    keys = jax.random.split(key, num_layers + 1)
    wqkv, wp, bp, lng, lnb, w1, b1, w2, b2 = ([] for _ in range(9))
    for li in range(num_layers):
        ks = jax.random.split(keys[li], 8)
        w = nrm(ks[0], (dim, 3 * dim))                 # qkv Linear, no bias
        w = w.at[:, :dim].multiply(scale)              # fold softmax scale into Wq
        wqkv.append(w.astype(dot_dtype))
        wp.append(nrm(ks[1], (dim, dim)).astype(dot_dtype))
        bp.append(nrm(ks[2], (1, dim)))
        lng.append(jnp.ones((1, dim), jnp.float32))
        lnb.append(jnp.zeros((1, dim), jnp.float32))
        w1.append(nrm(ks[3], (dim, mlp_size)).astype(dot_dtype))
        b1.append(nrm(ks[4], (1, mlp_size)))
        w2.append(nrm(ks[5], (mlp_size, dim)).astype(dot_dtype))
        b2.append(nrm(ks[6], (1, dim)))

    ks = jax.random.split(keys[-1], 4)
    wfc = jnp.zeros((dim, ncls_pad), jnp.float32).at[:, :num_classes].set(
        nrm(ks[2], (dim, num_classes)))
    bfc = jnp.zeros((1, ncls_pad), jnp.float32).at[:, :num_classes].set(
        nrm(ks[3], (1, num_classes)))

    stack = lambda xs: jnp.stack(xs, axis=0)
    return dict(
        pos_emb=sinusoidal_embedding(seq_len, dim),
        wqkv=stack(wqkv), wp=stack(wp), bp=stack(bp),
        lng=stack(lng), lnb=stack(lnb),
        w1=stack(w1), b1=stack(b1), w2=stack(w2), b2=stack(b2),
        lng_f=jnp.ones((1, dim), jnp.float32),
        lnb_f=jnp.zeros((1, dim), jnp.float32),
        wpool=nrm(ks[0], (1, dim)), bpool=nrm(ks[1], (1, 1)),
        wfc=wfc.astype(dot_dtype), bfc=bfc,
    )


# ---------------------------------------------------------------------------
if __name__ == "__main__":
    B, N, DIM = 2, 8, 32
    NUM_LAYERS, NUM_HEADS, MLP_SIZE, NUM_CLASSES = 2, 2, 64, 10

    key = jax.random.PRNGKey(0)
    kx, kp = jax.random.split(key)
    x = jax.random.normal(kx, (B, N, DIM), dtype=jnp.float32)

    params = init_params(kp, dim=DIM, num_layers=NUM_LAYERS, num_heads=NUM_HEADS,
                         mlp_size=MLP_SIZE, num_classes=NUM_CLASSES, seq_len=N)

    out = transformer_forward(params, x, num_heads=NUM_HEADS,
                              num_classes=NUM_CLASSES)
    out = jax.block_until_ready(out)
    assert out.shape == (B, NUM_CLASSES)
    print("KERNEL_OK")
</pallas_src>

<mosaic_0001>
module attributes {stable_mosaic.version = 11 : i64} {
  func.func @fused_transformer_kernel(%arg0: i32, %arg1: memref<1x8x32xf32, #tpu.memory_space<vmem>>, %arg2: memref<1x8x32xf32, #tpu.memory_space<vmem>>, %arg3: memref<2x32x96xbf16, #tpu.memory_space<vmem>>, %arg4: memref<2x32x32xbf16, #tpu.memory_space<vmem>>, %arg5: memref<2x1x32xf32, #tpu.memory_space<vmem>>, %arg6: memref<2x1x32xf32, #tpu.memory_space<vmem>>, %arg7: memref<2x1x32xf32, #tpu.memory_space<vmem>>, %arg8: memref<2x32x64xbf16, #tpu.memory_space<vmem>>, %arg9: memref<2x1x64xf32, #tpu.memory_space<vmem>>, %arg10: memref<2x64x32xbf16, #tpu.memory_space<vmem>>, %arg11: memref<2x1x32xf32, #tpu.memory_space<vmem>>, %arg12: memref<1x32xf32, #tpu.memory_space<vmem>>, %arg13: memref<1x32xf32, #tpu.memory_space<vmem>>, %arg14: memref<1x32xf32, #tpu.memory_space<vmem>>, %arg15: memref<1x1xf32, #tpu.memory_space<vmem>>, %arg16: memref<32x128xbf16, #tpu.memory_space<vmem>>, %arg17: memref<1x128xf32, #tpu.memory_space<vmem>>, %arg18: memref<1x1x128xf32, #tpu.memory_space<vmem>>) attributes {dimension_semantics = [#tpu.dimension_semantics<parallel>], iteration_bounds = array<i64: 2>, scalar_prefetch = 0 : i64, scratch_operands = 0 : i64, tpu.core_type = #tpu.core_type<tc>, window_params = [{transform_indices = @transform_0, window_bounds = array<i64: 1, 8, 32>}, {pipeline_mode = #tpu.pipeline_mode<synchronous>, transform_indices = @transform_1, window_bounds = array<i64: 1, 8, 32>}, {pipeline_mode = #tpu.pipeline_mode<synchronous>, transform_indices = @transform_2, window_bounds = array<i64: 2, 32, 96>}, {pipeline_mode = #tpu.pipeline_mode<synchronous>, transform_indices = @transform_3, window_bounds = array<i64: 2, 32, 32>}, {pipeline_mode = #tpu.pipeline_mode<synchronous>, transform_indices = @transform_4, window_bounds = array<i64: 2, 1, 32>}, {pipeline_mode = #tpu.pipeline_mode<synchronous>, transform_indices = @transform_5, window_bounds = array<i64: 2, 1, 32>}, {pipeline_mode = #tpu.pipeline_mode<synchronous>, transform_indices = @transform_6, window_bounds = array<i64: 2, 1, 32>}, {pipeline_mode = #tpu.pipeline_mode<synchronous>, transform_indices = @transform_7, window_bounds = array<i64: 2, 32, 64>}, {pipeline_mode = #tpu.pipeline_mode<synchronous>, transform_indices = @transform_8, window_bounds = array<i64: 2, 1, 64>}, {pipeline_mode = #tpu.pipeline_mode<synchronous>, transform_indices = @transform_9, window_bounds = array<i64: 2, 64, 32>}, {pipeline_mode = #tpu.pipeline_mode<synchronous>, transform_indices = @transform_10, window_bounds = array<i64: 2, 1, 32>}, {pipeline_mode = #tpu.pipeline_mode<synchronous>, transform_indices = @transform_11, window_bounds = array<i64: 1, 32>}, {pipeline_mode = #tpu.pipeline_mode<synchronous>, transform_indices = @transform_12, window_bounds = array<i64: 1, 32>}, {pipeline_mode = #tpu.pipeline_mode<synchronous>, transform_indices = @transform_13, window_bounds = array<i64: 1, 32>}, {pipeline_mode = #tpu.pipeline_mode<synchronous>, transform_indices = @transform_14, window_bounds = array<i64: 1, 1>}, {pipeline_mode = #tpu.pipeline_mode<synchronous>, transform_indices = @transform_15, window_bounds = array<i64: 32, 128>}, {pipeline_mode = #tpu.pipeline_mode<synchronous>, transform_indices = @transform_16, window_bounds = array<i64: 1, 128>}, {transform_indices = @transform_17, window_bounds = array<i64: 1, 1, 128>}]} {
    %c0 = arith.constant 0 : index
    %c0_0 = arith.constant 0 : index
    %c0_1 = arith.constant 0 : index
    %0 = vector.load %arg1[%c0, %c0_0, %c0_1] : memref<1x8x32xf32, #tpu.memory_space<vmem>>, vector<1x8x32xf32>
    %c0_2 = arith.constant 0 : index
    %c0_3 = arith.constant 0 : index
    %c0_4 = arith.constant 0 : index
    %1 = vector.load %arg2[%c0_2, %c0_3, %c0_4] : memref<1x8x32xf32, #tpu.memory_space<vmem>>, vector<1x8x32xf32>
    %2 = arith.addf %0, %1 : vector<1x8x32xf32>
    %3 = vector.shape_cast %2 : vector<1x8x32xf32> to vector<8x32xf32>
    %4 = arith.truncf %3 : vector<8x32xf32> to vector<8x32xbf16>
    %c0_5 = arith.constant 0 : index
    %c0_6 = arith.constant 0 : index
    %c0_7 = arith.constant 0 : index
    %5 = vector.load %arg3[%c0_5, %c0_6, %c0_7] : memref<2x32x96xbf16, #tpu.memory_space<vmem>>, vector<1x32x96xbf16>
    %6 = vector.shape_cast %5 : vector<1x32x96xbf16> to vector<32x96xbf16>
    %cst = arith.constant dense<0.000000e+00> : vector<8x96xf32>
    %7 = tpu.matmul %4, %6, %cst {dimension_numbers = #tpu.dot_dimension_numbers<[1], [0], [0], [1], [0, 0, 1, 1], [], []>} : vector<8x32xbf16>, vector<32x96xbf16>, vector<8x96xf32> -> vector<8x96xf32>
    %8 = vector.extract_strided_slice %7 {offsets = [0, 0], sizes = [8, 16], strides = [1, 1]} : vector<8x96xf32> to vector<8x16xf32>
    %9 = vector.shape_cast %8 : vector<8x16xf32> to vector<1x8x16xf32>
    %10 = vector.extract_strided_slice %7 {offsets = [0, 32], sizes = [8, 16], strides = [1, 1]} : vector<8x96xf32> to vector<8x16xf32>
    %11 = vector.shape_cast %10 : vector<8x16xf32> to vector<1x8x16xf32>
    %12 = vector.extract_strided_slice %7 {offsets = [0, 64], sizes = [8, 16], strides = [1, 1]} : vector<8x96xf32> to vector<8x16xf32>
    %13 = vector.shape_cast %12 : vector<8x16xf32> to vector<1x8x16xf32>
    %14 = arith.truncf %9 : vector<1x8x16xf32> to vector<1x8x16xbf16>
    %15 = arith.truncf %11 : vector<1x8x16xf32> to vector<1x8x16xbf16>
    "tpu.trace_start"() <{level = 10 : i32, message = "bqd,bkd->bqk"}> : () -> ()
    %cst_8 = arith.constant dense<0.000000e+00> : vector<1x8x8xf32>
    %16 = tpu.matmul %14, %15, %cst_8 {dimension_numbers = #tpu.dot_dimension_numbers<[2], [2], [1], [1], [0, 0, 0, 1, 1, 1], [0], [0]>} : vector<1x8x16xbf16>, vector<1x8x16xbf16>, vector<1x8x8xf32> -> vector<1x8x8xf32>
    "tpu.trace_stop"() : () -> ()
    %cst_9 = arith.constant dense<0xFF800000> : vector<1x8xf32>
    %17 = vector.multi_reduction <maximumf>, %16, %cst_9 [2] : vector<1x8x8xf32> to vector<1x8xf32>
    %18 = vector.shape_cast %17 : vector<1x8xf32> to vector<1x8x1xf32>
    %19 = vector.broadcast %18 : vector<1x8x1xf32> to vector<1x8x8xf32>
    %20 = arith.subf %16, %19 : vector<1x8x8xf32>
    %21 = math.exp %20 : vector<1x8x8xf32>
    %cst_10 = arith.constant dense<0.000000e+00> : vector<1x8xf32>
    %22 = vector.multi_reduction <add>, %21, %cst_10 [2] : vector<1x8x8xf32> to vector<1x8xf32>
    %23 = vector.shape_cast %22 : vector<1x8xf32> to vector<1x8x1xf32>
    %24 = vector.broadcast %23 : vector<1x8x1xf32> to vector<1x8x8xf32>
    %25 = arith.divf %21, %24 : vector<1x8x8xf32>
    %26 = arith.truncf %25 : vector<1x8x8xf32> to vector<1x8x8xbf16>
    %27 = arith.truncf %13 : vector<1x8x16xf32> to vector<1x8x16xbf16>
    "tpu.trace_start"() <{level = 10 : i32, message = "bqk,bkd->bqd"}> : () -> ()
    %cst_11 = arith.constant dense<0.000000e+00> : vector<1x8x16xf32>
    %28 = tpu.matmul %26, %27, %cst_11 {dimension_numbers = #tpu.dot_dimension_numbers<[2], [1], [1], [2], [0, 0, 0, 1, 1, 2], [0], [0]>} : vector<1x8x8xbf16>, vector<1x8x16xbf16>, vector<1x8x16xf32> -> vector<1x8x16xf32>
    "tpu.trace_stop"() : () -> ()
    %29 = vector.shape_cast %28 : vector<1x8x16xf32> to vector<8x16xf32>
    %30 = vector.extract_strided_slice %7 {offsets = [0, 16], sizes = [8, 16], strides = [1, 1]} : vector<8x96xf32> to vector<8x16xf32>
    %31 = vector.shape_cast %30 : vector<8x16xf32> to vector<1x8x16xf32>
    %32 = vector.extract_strided_slice %7 {offsets = [0, 48], sizes = [8, 16], strides = [1, 1]} : vector<8x96xf32> to vector<8x16xf32>
    %33 = vector.shape_cast %32 : vector<8x16xf32> to vector<1x8x16xf32>
    %34 = vector.extract_strided_slice %7 {offsets = [0, 80], sizes = [8, 16], strides = [1, 1]} : vector<8x96xf32> to vector<8x16xf32>
    %35 = vector.shape_cast %34 : vector<8x16xf32> to vector<1x8x16xf32>
    %36 = arith.truncf %31 : vector<1x8x16xf32> to vector<1x8x16xbf16>
    %37 = arith.truncf %33 : vector<1x8x16xf32> to vector<1x8x16xbf16>
    "tpu.trace_start"() <{level = 10 : i32, message = "bqd,bkd->bqk"}> : () -> ()
    %cst_12 = arith.constant dense<0.000000e+00> : vector<1x8x8xf32>
    %38 = tpu.matmul %36, %37, %cst_12 {dimension_numbers = #tpu.dot_dimension_numbers<[2], [2], [1], [1], [0, 0, 0, 1, 1, 1], [0], [0]>} : vector<1x8x16xbf16>, vector<1x8x16xbf16>, vector<1x8x8xf32> -> vector<1x8x8xf32>
    "tpu.trace_stop"() : () -> ()
    %cst_13 = arith.constant dense<0xFF800000> : vector<1x8xf32>
    %39 = vector.multi_reduction <maximumf>, %38, %cst_13 [2] : vector<1x8x8xf32> to vector<1x8xf32>
    %40 = vector.shape_cast %39 : vector<1x8xf32> to vector<1x8x1xf32>
    %41 = vector.broadcast %40 : vector<1x8x1xf32> to vector<1x8x8xf32>
    %42 = arith.subf %38, %41 : vector<1x8x8xf32>
    %43 = math.exp %42 : vector<1x8x8xf32>
    %cst_14 = arith.constant dense<0.000000e+00> : vector<1x8xf32>
    %44 = vector.multi_reduction <add>, %43, %cst_14 [2] : vector<1x8x8xf32> to vector<1x8xf32>
    %45 = vector.shape_cast %44 : vector<1x8xf32> to vector<1x8x1xf32>
    %46 = vector.broadcast %45 : vector<1x8x1xf32> to vector<1x8x8xf32>
    %47 = arith.divf %43, %46 : vector<1x8x8xf32>
    %48 = arith.truncf %47 : vector<1x8x8xf32> to vector<1x8x8xbf16>
    %49 = arith.truncf %35 : vector<1x8x16xf32> to vector<1x8x16xbf16>
    "tpu.trace_start"() <{level = 10 : i32, message = "bqk,bkd->bqd"}> : () -> ()
    %cst_15 = arith.constant dense<0.000000e+00> : vector<1x8x16xf32>
    %50 = tpu.matmul %48, %49, %cst_15 {dimension_numbers = #tpu.dot_dimension_numbers<[2], [1], [1], [2], [0, 0, 0, 1, 1, 2], [0], [0]>} : vector<1x8x8xbf16>, vector<1x8x16xbf16>, vector<1x8x16xf32> -> vector<1x8x16xf32>
    "tpu.trace_stop"() : () -> ()
    %51 = vector.shape_cast %50 : vector<1x8x16xf32> to vector<8x16xf32>
    %52 = tpu.concatenate %29, %51 in 1 : vector<8x16xf32>, vector<8x16xf32> -> vector<8x32xf32>
    %53 = arith.truncf %52 : vector<8x32xf32> to vector<8x32xbf16>
    %c0_16 = arith.constant 0 : index
    %c0_17 = arith.constant 0 : index
    %c0_18 = arith.constant 0 : index
    %54 = vector.load %arg4[%c0_16, %c0_17, %c0_18] : memref<2x32x32xbf16, #tpu.memory_space<vmem>>, vector<1x32x32xbf16>
    %55 = vector.shape_cast %54 : vector<1x32x32xbf16> to vector<32x32xbf16>
    %cst_19 = arith.constant dense<0.000000e+00> : vector<8x32xf32>
    %56 = tpu.matmul %53, %55, %cst_19 {dimension_numbers = #tpu.dot_dimension_numbers<[1], [0], [0], [1], [0, 0, 1, 1], [], []>} : vector<8x32xbf16>, vector<32x32xbf16>, vector<8x32xf32> -> vector<8x32xf32>
    %57 = arith.addf %3, %56 : vector<8x32xf32>
    %c0_20 = arith.constant 0 : index
    %c0_21 = arith.constant 0 : index
    %c0_22 = arith.constant 0 : index
    %58 = vector.load %arg5[%c0_20, %c0_21, %c0_22] : memref<2x1x32xf32, #tpu.memory_space<vmem>>, vector<1x1x32xf32>
    %59 = vector.shape_cast %58 : vector<1x1x32xf32> to vector<1x32xf32>
    %60 = vector.broadcast %59 : vector<1x32xf32> to vector<8x32xf32>
    %61 = arith.addf %57, %60 : vector<8x32xf32>
    %c0_23 = arith.constant 0 : index
    %c0_24 = arith.constant 0 : index
    %c0_25 = arith.constant 0 : index
    %62 = vector.load %arg6[%c0_23, %c0_24, %c0_25] : memref<2x1x32xf32, #tpu.memory_space<vmem>>, vector<1x1x32xf32>
    %63 = vector.shape_cast %62 : vector<1x1x32xf32> to vector<1x32xf32>
    %c0_26 = arith.constant 0 : index
    %c0_27 = arith.constant 0 : index
    %c0_28 = arith.constant 0 : index
    %64 = vector.load %arg7[%c0_26, %c0_27, %c0_28] : memref<2x1x32xf32, #tpu.memory_space<vmem>>, vector<1x1x32xf32>
    %65 = vector.shape_cast %64 : vector<1x1x32xf32> to vector<1x32xf32>
    %cst_29 = arith.constant dense<0.000000e+00> : vector<8xf32>
    %66 = vector.multi_reduction <add>, %61, %cst_29 [1] : vector<8x32xf32> to vector<8xf32>
    %67 = vector.shape_cast %66 : vector<8xf32> to vector<8x1xf32>
    %cst_30 = arith.constant 3.200000e+01 : f32
    %68 = vector.broadcast %cst_30 : f32 to vector<8x1xf32>
    %69 = arith.divf %67, %68 : vector<8x1xf32>
    %70 = vector.broadcast %69 : vector<8x1xf32> to vector<8x32xf32>
    %71 = arith.subf %61, %70 : vector<8x32xf32>
    %72 = arith.mulf %71, %71 : vector<8x32xf32>
    %cst_31 = arith.constant dense<0.000000e+00> : vector<8xf32>
    %73 = vector.multi_reduction <add>, %72, %cst_31 [1] : vector<8x32xf32> to vector<8xf32>
    %74 = vector.shape_cast %73 : vector<8xf32> to vector<8x1xf32>
    %cst_32 = arith.constant 3.200000e+01 : f32
    %75 = vector.broadcast %cst_32 : f32 to vector<8x1xf32>
    %76 = arith.divf %74, %75 : vector<8x1xf32>
    %77 = vector.broadcast %69 : vector<8x1xf32> to vector<8x32xf32>
    %78 = arith.subf %61, %77 : vector<8x32xf32>
    %cst_33 = arith.constant 9.99999974E-6 : f32
    %79 = vector.broadcast %cst_33 : f32 to vector<8x1xf32>
    %80 = arith.addf %76, %79 : vector<8x1xf32>
    %81 = math.rsqrt %80 : vector<8x1xf32>
    %82 = vector.broadcast %81 : vector<8x1xf32> to vector<8x32xf32>
    %83 = arith.mulf %78, %82 : vector<8x32xf32>
    %84 = vector.broadcast %63 : vector<1x32xf32> to vector<8x32xf32>
    %85 = arith.mulf %83, %84 : vector<8x32xf32>
    %86 = vector.broadcast %65 : vector<1x32xf32> to vector<8x32xf32>
    %87 = arith.addf %85, %86 : vector<8x32xf32>
    %88 = arith.truncf %87 : vector<8x32xf32> to vector<8x32xbf16>
    %c0_34 = arith.constant 0 : index
    %c0_35 = arith.constant 0 : index
    %c0_36 = arith.constant 0 : index
    %89 = vector.load %arg8[%c0_34, %c0_35, %c0_36] : memref<2x32x64xbf16, #tpu.memory_space<vmem>>, vector<1x32x64xbf16>
    %90 = vector.shape_cast %89 : vector<1x32x64xbf16> to vector<32x64xbf16>
    %cst_37 = arith.constant dense<0.000000e+00> : vector<8x64xf32>
    %91 = tpu.matmul %88, %90, %cst_37 {dimension_numbers = #tpu.dot_dimension_numbers<[1], [0], [0], [1], [0, 0, 1, 1], [], []>} : vector<8x32xbf16>, vector<32x64xbf16>, vector<8x64xf32> -> vector<8x64xf32>
    %c0_38 = arith.constant 0 : index
    %c0_39 = arith.constant 0 : index
    %c0_40 = arith.constant 0 : index
    %92 = vector.load %arg9[%c0_38, %c0_39, %c0_40] : memref<2x1x64xf32, #tpu.memory_space<vmem>>, vector<1x1x64xf32>
    %93 = vector.shape_cast %92 : vector<1x1x64xf32> to vector<1x64xf32>
    %94 = vector.broadcast %93 : vector<1x64xf32> to vector<8x64xf32>
    %95 = arith.addf %91, %94 : vector<8x64xf32>
    %cst_41 = arith.constant 5.000000e-01 : f32
    %96 = vector.broadcast %cst_41 : f32 to vector<8x64xf32>
    %97 = arith.mulf %96, %95 : vector<8x64xf32>
    %cst_42 = arith.constant 0.707106769 : f32
    %98 = vector.broadcast %cst_42 : f32 to vector<8x64xf32>
    %99 = arith.mulf %95, %98 : vector<8x64xf32>
    %100 = math.erf %99 : vector<8x64xf32>
    %cst_43 = arith.constant 1.000000e+00 : f32
    %101 = vector.broadcast %cst_43 : f32 to vector<8x64xf32>
    %102 = arith.addf %101, %100 : vector<8x64xf32>
    %103 = arith.mulf %97, %102 : vector<8x64xf32>
    %104 = arith.truncf %103 : vector<8x64xf32> to vector<8x64xbf16>
    %c0_44 = arith.constant 0 : index
    %c0_45 = arith.constant 0 : index
    %c0_46 = arith.constant 0 : index
    %105 = vector.load %arg10[%c0_44, %c0_45, %c0_46] : memref<2x64x32xbf16, #tpu.memory_space<vmem>>, vector<1x64x32xbf16>
    %106 = vector.shape_cast %105 : vector<1x64x32xbf16> to vector<64x32xbf16>
    %cst_47 = arith.constant dense<0.000000e+00> : vector<8x32xf32>
    %107 = tpu.matmul %104, %106, %cst_47 {dimension_numbers = #tpu.dot_dimension_numbers<[1], [0], [0], [1], [0, 0, 1, 1], [], []>} : vector<8x64xbf16>, vector<64x32xbf16>, vector<8x32xf32> -> vector<8x32xf32>
    %108 = arith.addf %61, %107 : vector<8x32xf32>
    %c0_48 = arith.constant 0 : index
    %c0_49 = arith.constant 0 : index
    %c0_50 = arith.constant 0 : index
    %109 = vector.load %arg11[%c0_48, %c0_49, %c0_50] : memref<2x1x32xf32, #tpu.memory_space<vmem>>, vector<1x1x32xf32>
    %110 = vector.shape_cast %109 : vector<1x1x32xf32> to vector<1x32xf32>
    %111 = vector.broadcast %110 : vector<1x32xf32> to vector<8x32xf32>
    %112 = arith.addf %108, %111 : vector<8x32xf32>
    %113 = arith.truncf %112 : vector<8x32xf32> to vector<8x32xbf16>
    %c1 = arith.constant 1 : index
    %c0_51 = arith.constant 0 : index
    %c0_52 = arith.constant 0 : index
    %114 = vector.load %arg3[%c1, %c0_51, %c0_52] : memref<2x32x96xbf16, #tpu.memory_space<vmem>>, vector<1x32x96xbf16>
    %115 = vector.shape_cast %114 : vector<1x32x96xbf16> to vector<32x96xbf16>
    %cst_53 = arith.constant dense<0.000000e+00> : vector<8x96xf32>
    %116 = tpu.matmul %113, %115, %cst_53 {dimension_numbers = #tpu.dot_dimension_numbers<[1], [0], [0], [1], [0, 0, 1, 1], [], []>} : vector<8x32xbf16>, vector<32x96xbf16>, vector<8x96xf32> -> vector<8x96xf32>
    %117 = vector.extract_strided_slice %116 {offsets = [0, 0], sizes = [8, 16], strides = [1, 1]} : vector<8x96xf32> to vector<8x16xf32>
    %118 = vector.shape_cast %117 : vector<8x16xf32> to vector<1x8x16xf32>
    %119 = vector.extract_strided_slice %116 {offsets = [0, 32], sizes = [8, 16], strides = [1, 1]} : vector<8x96xf32> to vector<8x16xf32>
    %120 = vector.shape_cast %119 : vector<8x16xf32> to vector<1x8x16xf32>
    %121 = vector.extract_strided_slice %116 {offsets = [0, 64], sizes = [8, 16], strides = [1, 1]} : vector<8x96xf32> to vector<8x16xf32>
    %122 = vector.shape_cast %121 : vector<8x16xf32> to vector<1x8x16xf32>
    %123 = arith.truncf %118 : vector<1x8x16xf32> to vector<1x8x16xbf16>
    %124 = arith.truncf %120 : vector<1x8x16xf32> to vector<1x8x16xbf16>
    "tpu.trace_start"() <{level = 10 : i32, message = "bqd,bkd->bqk"}> : () -> ()
    %cst_54 = arith.constant dense<0.000000e+00> : vector<1x8x8xf32>
    %125 = tpu.matmul %123, %124, %cst_54 {dimension_numbers = #tpu.dot_dimension_numbers<[2], [2], [1], [1], [0, 0, 0, 1, 1, 1], [0], [0]>} : vector<1x8x16xbf16>, vector<1x8x16xbf16>, vector<1x8x8xf32> -> vector<1x8x8xf32>
    "tpu.trace_stop"() : () -> ()
    %cst_55 = arith.constant dense<0xFF800000> : vector<1x8xf32>
    %126 = vector.multi_reduction <maximumf>, %125, %cst_55 [2] : vector<1x8x8xf32> to vector<1x8xf32>
    %127 = vector.shape_cast %126 : vector<1x8xf32> to vector<1x8x1xf32>
    %128 = vector.broadcast %127 : vector<1x8x1xf32> to vector<1x8x8xf32>
    %129 = arith.subf %125, %128 : vector<1x8x8xf32>
    %130 = math.exp %129 : vector<1x8x8xf32>
    %cst_56 = arith.constant dense<0.000000e+00> : vector<1x8xf32>
    %131 = vector.multi_reduction <add>, %130, %cst_56 [2] : vector<1x8x8xf32> to vector<1x8xf32>
    %132 = vector.shape_cast %131 : vector<1x8xf32> to vector<1x8x1xf32>
    %133 = vector.broadcast %132 : vector<1x8x1xf32> to vector<1x8x8xf32>
    %134 = arith.divf %130, %133 : vector<1x8x8xf32>
    %135 = arith.truncf %134 : vector<1x8x8xf32> to vector<1x8x8xbf16>
    %136 = arith.truncf %122 : vector<1x8x16xf32> to vector<1x8x16xbf16>
    "tpu.trace_start"() <{level = 10 : i32, message = "bqk,bkd->bqd"}> : () -> ()
    %cst_57 = arith.constant dense<0.000000e+00> : vector<1x8x16xf32>
    %137 = tpu.matmul %135, %136, %cst_57 {dimension_numbers = #tpu.dot_dimension_numbers<[2], [1], [1], [2], [0, 0, 0, 1, 1, 2], [0], [0]>} : vector<1x8x8xbf16>, vector<1x8x16xbf16>, vector<1x8x16xf32> -> vector<1x8x16xf32>
    "tpu.trace_stop"() : () -> ()
    %138 = vector.shape_cast %137 : vector<1x8x16xf32> to vector<8x16xf32>
    %139 = vector.extract_strided_slice %116 {offsets = [0, 16], sizes = [8, 16], strides = [1, 1]} : vector<8x96xf32> to vector<8x16xf32>
    %140 = vector.shape_cast %139 : vector<8x16xf32> to vector<1x8x16xf32>
    %141 = vector.extract_strided_slice %116 {offsets = [0, 48], sizes = [8, 16], strides = [1, 1]} : vector<8x96xf32> to vector<8x16xf32>
    %142 = vector.shape_cast %141 : vector<8x16xf32> to vector<1x8x16xf32>
    %143 = vector.extract_strided_slice %116 {offsets = [0, 80], sizes = [8, 16], strides = [1, 1]} : vector<8x96xf32> to vector<8x16xf32>
    %144 = vector.shape_cast %143 : vector<8x16xf32> to vector<1x8x16xf32>
    %145 = arith.truncf %140 : vector<1x8x16xf32> to vector<1x8x16xbf16>
    %146 = arith.truncf %142 : vector<1x8x16xf32> to vector<1x8x16xbf16>
    "tpu.trace_start"() <{level = 10 : i32, message = "bqd,bkd->bqk"}> : () -> ()
    %cst_58 = arith.constant dense<0.000000e+00> : vector<1x8x8xf32>
    %147 = tpu.matmul %145, %146, %cst_58 {dimension_numbers = #tpu.dot_dimension_numbers<[2], [2], [1], [1], [0, 0, 0, 1, 1, 1], [0], [0]>} : vector<1x8x16xbf16>, vector<1x8x16xbf16>, vector<1x8x8xf32> -> vector<1x8x8xf32>
    "tpu.trace_stop"() : () -> ()
    %cst_59 = arith.constant dense<0xFF800000> : vector<1x8xf32>
    %148 = vector.multi_reduction <maximumf>, %147, %cst_59 [2] : vector<1x8x8xf32> to vector<1x8xf32>
    %149 = vector.shape_cast %148 : vector<1x8xf32> to vector<1x8x1xf32>
    %150 = vector.broadcast %149 : vector<1x8x1xf32> to vector<1x8x8xf32>
    %151 = arith.subf %147, %150 : vector<1x8x8xf32>
    %152 = math.exp %151 : vector<1x8x8xf32>
    %cst_60 = arith.constant dense<0.000000e+00> : vector<1x8xf32>
    %153 = vector.multi_reduction <add>, %152, %cst_60 [2] : vector<1x8x8xf32> to vector<1x8xf32>
    %154 = vector.shape_cast %153 : vector<1x8xf32> to vector<1x8x1xf32>
    %155 = vector.broadcast %154 : vector<1x8x1xf32> to vector<1x8x8xf32>
    %156 = arith.divf %152, %155 : vector<1x8x8xf32>
    %157 = arith.truncf %156 : vector<1x8x8xf32> to vector<1x8x8xbf16>
    %158 = arith.truncf %144 : vector<1x8x16xf32> to vector<1x8x16xbf16>
    "tpu.trace_start"() <{level = 10 : i32, message = "bqk,bkd->bqd"}> : () -> ()
    %cst_61 = arith.constant dense<0.000000e+00> : vector<1x8x16xf32>
    %159 = tpu.matmul %157, %158, %cst_61 {dimension_numbers = #tpu.dot_dimension_numbers<[2], [1], [1], [2], [0, 0, 0, 1, 1, 2], [0], [0]>} : vector<1x8x8xbf16>, vector<1x8x16xbf16>, vector<1x8x16xf32> -> vector<1x8x16xf32>
    "tpu.trace_stop"() : () -> ()
    %160 = vector.shape_cast %159 : vector<1x8x16xf32> to vector<8x16xf32>
    %161 = tpu.concatenate %138, %160 in 1 : vector<8x16xf32>, vector<8x16xf32> -> vector<8x32xf32>
    %162 = arith.truncf %161 : vector<8x32xf32> to vector<8x32xbf16>
    %c1_62 = arith.constant 1 : index
    %c0_63 = arith.constant 0 : index
    %c0_64 = arith.constant 0 : index
    %163 = vector.load %arg4[%c1_62, %c0_63, %c0_64] : memref<2x32x32xbf16, #tpu.memory_space<vmem>>, vector<1x32x32xbf16>
    %164 = vector.shape_cast %163 : vector<1x32x32xbf16> to vector<32x32xbf16>
    %cst_65 = arith.constant dense<0.000000e+00> : vector<8x32xf32>
    %165 = tpu.matmul %162, %164, %cst_65 {dimension_numbers = #tpu.dot_dimension_numbers<[1], [0], [0], [1], [0, 0, 1, 1], [], []>} : vector<8x32xbf16>, vector<32x32xbf16>, vector<8x32xf32> -> vector<8x32xf32>
    %166 = arith.addf %112, %165 : vector<8x32xf32>
    %c1_66 = arith.constant 1 : index
    %c0_67 = arith.constant 0 : index
    %c0_68 = arith.constant 0 : index
    %167 = vector.load %arg5[%c1_66, %c0_67, %c0_68] : memref<2x1x32xf32, #tpu.memory_space<vmem>>, vector<1x1x32xf32>
    %168 = vector.shape_cast %167 : vector<1x1x32xf32> to vector<1x32xf32>
    %169 = vector.broadcast %168 : vector<1x32xf32> to vector<8x32xf32>
    %170 = arith.addf %166, %169 : vector<8x32xf32>
    %c1_69 = arith.constant 1 : index
    %c0_70 = arith.constant 0 : index
    %c0_71 = arith.constant 0 : index
    %171 = vector.load %arg6[%c1_69, %c0_70, %c0_71] : memref<2x1x32xf32, #tpu.memory_space<vmem>>, vector<1x1x32xf32>
    %172 = vector.shape_cast %171 : vector<1x1x32xf32> to vector<1x32xf32>
    %c1_72 = arith.constant 1 : index
    %c0_73 = arith.constant 0 : index
    %c0_74 = arith.constant 0 : index
    %173 = vector.load %arg7[%c1_72, %c0_73, %c0_74] : memref<2x1x32xf32, #tpu.memory_space<vmem>>, vector<1x1x32xf32>
    %174 = vector.shape_cast %173 : vector<1x1x32xf32> to vector<1x32xf32>
    %cst_75 = arith.constant dense<0.000000e+00> : vector<8xf32>
    %175 = vector.multi_reduction <add>, %170, %cst_75 [1] : vector<8x32xf32> to vector<8xf32>
    %176 = vector.shape_cast %175 : vector<8xf32> to vector<8x1xf32>
    %cst_76 = arith.constant 3.200000e+01 : f32
    %177 = vector.broadcast %cst_76 : f32 to vector<8x1xf32>
    %178 = arith.divf %176, %177 : vector<8x1xf32>
    %179 = vector.broadcast %178 : vector<8x1xf32> to vector<8x32xf32>
    %180 = arith.subf %170, %179 : vector<8x32xf32>
    %181 = arith.mulf %180, %180 : vector<8x32xf32>
    %cst_77 = arith.constant dense<0.000000e+00> : vector<8xf32>
    %182 = vector.multi_reduction <add>, %181, %cst_77 [1] : vector<8x32xf32> to vector<8xf32>
    %183 = vector.shape_cast %182 : vector<8xf32> to vector<8x1xf32>
    %cst_78 = arith.constant 3.200000e+01 : f32
    %184 = vector.broadcast %cst_78 : f32 to vector<8x1xf32>
    %185 = arith.divf %183, %184 : vector<8x1xf32>
    %186 = vector.broadcast %178 : vector<8x1xf32> to vector<8x32xf32>
    %187 = arith.subf %170, %186 : vector<8x32xf32>
    %cst_79 = arith.constant 9.99999974E-6 : f32
    %188 = vector.broadcast %cst_79 : f32 to vector<8x1xf32>
    %189 = arith.addf %185, %188 : vector<8x1xf32>
    %190 = math.rsqrt %189 : vector<8x1xf32>
    %191 = vector.broadcast %190 : vector<8x1xf32> to vector<8x32xf32>
    %192 = arith.mulf %187, %191 : vector<8x32xf32>
    %193 = vector.broadcast %172 : vector<1x32xf32> to vector<8x32xf32>
    %194 = arith.mulf %192, %193 : vector<8x32xf32>
    %195 = vector.broadcast %174 : vector<1x32xf32> to vector<8x32xf32>
    %196 = arith.addf %194, %195 : vector<8x32xf32>
    %197 = arith.truncf %196 : vector<8x32xf32> to vector<8x32xbf16>
    %c1_80 = arith.constant 1 : index
    %c0_81 = arith.constant 0 : index
    %c0_82 = arith.constant 0 : index
    %198 = vector.load %arg8[%c1_80, %c0_81, %c0_82] : memref<2x32x64xbf16, #tpu.memory_space<vmem>>, vector<1x32x64xbf16>
    %199 = vector.shape_cast %198 : vector<1x32x64xbf16> to vector<32x64xbf16>
    %cst_83 = arith.constant dense<0.000000e+00> : vector<8x64xf32>
    %200 = tpu.matmul %197, %199, %cst_83 {dimension_numbers = #tpu.dot_dimension_numbers<[1], [0], [0], [1], [0, 0, 1, 1], [], []>} : vector<8x32xbf16>, vector<32x64xbf16>, vector<8x64xf32> -> vector<8x64xf32>
    %c1_84 = arith.constant 1 : index
    %c0_85 = arith.constant 0 : index
    %c0_86 = arith.constant 0 : index
    %201 = vector.load %arg9[%c1_84, %c0_85, %c0_86] : memref<2x1x64xf32, #tpu.memory_space<vmem>>, vector<1x1x64xf32>
    %202 = vector.shape_cast %201 : vector<1x1x64xf32> to vector<1x64xf32>
    %203 = vector.broadcast %202 : vector<1x64xf32> to vector<8x64xf32>
    %204 = arith.addf %200, %203 : vector<8x64xf32>
    %cst_87 = arith.constant 5.000000e-01 : f32
    %205 = vector.broadcast %cst_87 : f32 to vector<8x64xf32>
    %206 = arith.mulf %205, %204 : vector<8x64xf32>
    %cst_88 = arith.constant 0.707106769 : f32
    %207 = vector.broadcast %cst_88 : f32 to vector<8x64xf32>
    %208 = arith.mulf %204, %207 : vector<8x64xf32>
    %209 = math.erf %208 : vector<8x64xf32>
    %cst_89 = arith.constant 1.000000e+00 : f32
    %210 = vector.broadcast %cst_89 : f32 to vector<8x64xf32>
    %211 = arith.addf %210, %209 : vector<8x64xf32>
    %212 = arith.mulf %206, %211 : vector<8x64xf32>
    %213 = arith.truncf %212 : vector<8x64xf32> to vector<8x64xbf16>
    %c1_90 = arith.constant 1 : index
    %c0_91 = arith.constant 0 : index
    %c0_92 = arith.constant 0 : index
    %214 = vector.load %arg10[%c1_90, %c0_91, %c0_92] : memref<2x64x32xbf16, #tpu.memory_space<vmem>>, vector<1x64x32xbf16>
    %215 = vector.shape_cast %214 : vector<1x64x32xbf16> to vector<64x32xbf16>
    %cst_93 = arith.constant dense<0.000000e+00> : vector<8x32xf32>
    %216 = tpu.matmul %213, %215, %cst_93 {dimension_numbers = #tpu.dot_dimension_numbers<[1], [0], [0], [1], [0, 0, 1, 1], [], []>} : vector<8x64xbf16>, vector<64x32xbf16>, vector<8x32xf32> -> vector<8x32xf32>
    %217 = arith.addf %170, %216 : vector<8x32xf32>
    %c1_94 = arith.constant 1 : index
    %c0_95 = arith.constant 0 : index
    %c0_96 = arith.constant 0 : index
    %218 = vector.load %arg11[%c1_94, %c0_95, %c0_96] : memref<2x1x32xf32, #tpu.memory_space<vmem>>, vector<1x1x32xf32>
    %219 = vector.shape_cast %218 : vector<1x1x32xf32> to vector<1x32xf32>
    %220 = vector.broadcast %219 : vector<1x32xf32> to vector<8x32xf32>
    %221 = arith.addf %217, %220 : vector<8x32xf32>
    %c0_97 = arith.constant 0 : index
    %c0_98 = arith.constant 0 : index
    %222 = vector.load %arg12[%c0_97, %c0_98] : memref<1x32xf32, #tpu.memory_space<vmem>>, vector<1x32xf32>
    %c0_99 = arith.constant 0 : index
    %c0_100 = arith.constant 0 : index
    %223 = vector.load %arg13[%c0_99, %c0_100] : memref<1x32xf32, #tpu.memory_space<vmem>>, vector<1x32xf32>
    %cst_101 = arith.constant dense<0.000000e+00> : vector<8xf32>
    %224 = vector.multi_reduction <add>, %221, %cst_101 [1] : vector<8x32xf32> to vector<8xf32>
    %225 = vector.shape_cast %224 : vector<8xf32> to vector<8x1xf32>
    %cst_102 = arith.constant 3.200000e+01 : f32
    %226 = vector.broadcast %cst_102 : f32 to vector<8x1xf32>
    %227 = arith.divf %225, %226 : vector<8x1xf32>
    %228 = vector.broadcast %227 : vector<8x1xf32> to vector<8x32xf32>
    %229 = arith.subf %221, %228 : vector<8x32xf32>
    %230 = arith.mulf %229, %229 : vector<8x32xf32>
    %cst_103 = arith.constant dense<0.000000e+00> : vector<8xf32>
    %231 = vector.multi_reduction <add>, %230, %cst_103 [1] : vector<8x32xf32> to vector<8xf32>
    %232 = vector.shape_cast %231 : vector<8xf32> to vector<8x1xf32>
    %cst_104 = arith.constant 3.200000e+01 : f32
    %233 = vector.broadcast %cst_104 : f32 to vector<8x1xf32>
    %234 = arith.divf %232, %233 : vector<8x1xf32>
    %235 = vector.broadcast %227 : vector<8x1xf32> to vector<8x32xf32>
    %236 = arith.subf %221, %235 : vector<8x32xf32>
    %cst_105 = arith.constant 9.99999974E-6 : f32
    %237 = vector.broadcast %cst_105 : f32 to vector<8x1xf32>
    %238 = arith.addf %234, %237 : vector<8x1xf32>
    %239 = math.rsqrt %238 : vector<8x1xf32>
    %240 = vector.broadcast %239 : vector<8x1xf32> to vector<8x32xf32>
    %241 = arith.mulf %236, %240 : vector<8x32xf32>
    %242 = vector.broadcast %222 : vector<1x32xf32> to vector<8x32xf32>
    %243 = arith.mulf %241, %242 : vector<8x32xf32>
    %244 = vector.broadcast %223 : vector<1x32xf32> to vector<8x32xf32>
    %245 = arith.addf %243, %244 : vector<8x32xf32>
    %246 = vector.shape_cast %245 : vector<8x32xf32> to vector<1x8x32xf32>
    %c0_106 = arith.constant 0 : index
    %c0_107 = arith.constant 0 : index
    %247 = vector.load %arg14[%c0_106, %c0_107] : memref<1x32xf32, #tpu.memory_space<vmem>>, vector<1x32xf32>
    %248 = vector.shape_cast %247 : vector<1x32xf32> to vector<1x1x32xf32>
    %249 = vector.broadcast %248 : vector<1x1x32xf32> to vector<1x8x32xf32>
    %250 = arith.mulf %246, %249 : vector<1x8x32xf32>
    %cst_108 = arith.constant dense<0.000000e+00> : vector<1x8xf32>
    %251 = vector.multi_reduction <add>, %250, %cst_108 [2] : vector<1x8x32xf32> to vector<1x8xf32>
    %252 = vector.shape_cast %251 : vector<1x8xf32> to vector<1x8x1xf32>
    %c0_109 = arith.constant 0 : index
    %c0_110 = arith.constant 0 : index
    %253 = vector.load %arg15[%c0_109, %c0_110] : memref<1x1xf32, #tpu.memory_space<vmem>>, vector<1x1xf32>
    %254 = vector.shape_cast %253 : vector<1x1xf32> to vector<1x1x1xf32>
    %255 = vector.broadcast %254 : vector<1x1x1xf32> to vector<1x8x1xf32>
    %256 = arith.addf %252, %255 : vector<1x8x1xf32>
    %cst_111 = arith.constant dense<0xFF800000> : vector<1x1xf32>
    %257 = vector.multi_reduction <maximumf>, %256, %cst_111 [1] : vector<1x8x1xf32> to vector<1x1xf32>
    %258 = vector.shape_cast %257 : vector<1x1xf32> to vector<1x1x1xf32>
    %259 = vector.broadcast %258 : vector<1x1x1xf32> to vector<1x8x1xf32>
    %260 = arith.subf %256, %259 : vector<1x8x1xf32>
    %261 = math.exp %260 : vector<1x8x1xf32>
    %cst_112 = arith.constant dense<0.000000e+00> : vector<1x1xf32>
    %262 = vector.multi_reduction <add>, %261, %cst_112 [1] : vector<1x8x1xf32> to vector<1x1xf32>
    %263 = vector.shape_cast %262 : vector<1x1xf32> to vector<1x1x1xf32>
    %264 = vector.broadcast %263 : vector<1x1x1xf32> to vector<1x8x1xf32>
    %265 = arith.divf %261, %264 : vector<1x8x1xf32>
    %266 = vector.broadcast %265 : vector<1x8x1xf32> to vector<1x8x32xf32>
    %267 = arith.mulf %266, %246 : vector<1x8x32xf32>
    %cst_113 = arith.constant dense<0.000000e+00> : vector<1x32xf32>
    %268 = vector.multi_reduction <add>, %267, %cst_113 [1] : vector<1x8x32xf32> to vector<1x32xf32>
    %269 = arith.truncf %268 : vector<1x32xf32> to vector<1x32xbf16>
    %c0_114 = arith.constant 0 : index
    %c0_115 = arith.constant 0 : index
    %270 = vector.load %arg16[%c0_114, %c0_115] : memref<32x128xbf16, #tpu.memory_space<vmem>>, vector<32x128xbf16>
    %cst_116 = arith.constant dense<0.000000e+00> : vector<1x128xf32>
    %271 = tpu.matmul %269, %270, %cst_116 {dimension_numbers = #tpu.dot_dimension_numbers<[1], [0], [0], [1], [0, 0, 1, 1], [], []>} : vector<1x32xbf16>, vector<32x128xbf16>, vector<1x128xf32> -> vector<1x128xf32>
    %c0_117 = arith.constant 0 : index
    %c0_118 = arith.constant 0 : index
    %272 = vector.load %arg17[%c0_117, %c0_118] : memref<1x128xf32, #tpu.memory_space<vmem>>, vector<1x128xf32>
    %273 = arith.addf %271, %272 : vector<1x128xf32>
    %274 = vector.shape_cast %273 : vector<1x128xf32> to vector<1x1x128xf32>
    %c0_119 = arith.constant 0 : index
    %c0_120 = arith.constant 0 : index
    %c0_121 = arith.constant 0 : index
    %275 = vector.load %arg18[%c0_119, %c0_120, %c0_121] : memref<1x1x128xf32, #tpu.memory_space<vmem>>, vector<1x1x128xf32>
    tpu.vector_store %arg18[%c0_119, %c0_120, %c0_121], %274 {strides = array<i32>} : memref<1x1x128xf32, #tpu.memory_space<vmem>>, vector<1x1x128xf32>,
    return
  }
  func.func @transform_0(%arg0: i32) -> (i32, i32, i32) {
    %c0_i32 = arith.constant 0 : i32
    %c0_i32_0 = arith.constant 0 : i32
    %c0_i32_1 = arith.constant 0 : i32
    return %arg0, %c0_i32, %c0_i32_0 : i32, i32, i32
  }
  func.func @transform_1(%arg0: i32) -> (i32, i32, i32) {
    %c0_i32 = arith.constant 0 : i32
    %c0_i32_0 = arith.constant 0 : i32
    %c0_i32_1 = arith.constant 0 : i32
    %c0_i32_2 = arith.constant 0 : i32
    return %c0_i32, %c0_i32_0, %c0_i32_1 : i32, i32, i32
  }
  func.func @transform_2(%arg0: i32) -> (i32, i32, i32) {
    %c0_i32 = arith.constant 0 : i32
    %c0_i32_0 = arith.constant 0 : i32
    %c0_i32_1 = arith.constant 0 : i32
    %c0_i32_2 = arith.constant 0 : i32
    return %c0_i32, %c0_i32_0, %c0_i32_1 : i32, i32, i32
  }
  func.func @transform_3(%arg0: i32) -> (i32, i32, i32) {
    %c0_i32 = arith.constant 0 : i32
    %c0_i32_0 = arith.constant 0 : i32
    %c0_i32_1 = arith.constant 0 : i32
    %c0_i32_2 = arith.constant 0 : i32
    return %c0_i32, %c0_i32_0, %c0_i32_1 : i32, i32, i32
  }
  func.func @transform_4(%arg0: i32) -> (i32, i32, i32) {
    %c0_i32 = arith.constant 0 : i32
    %c0_i32_0 = arith.constant 0 : i32
    %c0_i32_1 = arith.constant 0 : i32
    %c0_i32_2 = arith.constant 0 : i32
    return %c0_i32, %c0_i32_0, %c0_i32_1 : i32, i32, i32
  }
  func.func @transform_5(%arg0: i32) -> (i32, i32, i32) {
    %c0_i32 = arith.constant 0 : i32
    %c0_i32_0 = arith.constant 0 : i32
    %c0_i32_1 = arith.constant 0 : i32
    %c0_i32_2 = arith.constant 0 : i32
    return %c0_i32, %c0_i32_0, %c0_i32_1 : i32, i32, i32
  }
  func.func @transform_6(%arg0: i32) -> (i32, i32, i32) {
    %c0_i32 = arith.constant 0 : i32
    %c0_i32_0 = arith.constant 0 : i32
    %c0_i32_1 = arith.constant 0 : i32
    %c0_i32_2 = arith.constant 0 : i32
    return %c0_i32, %c0_i32_0, %c0_i32_1 : i32, i32, i32
  }
  func.func @transform_7(%arg0: i32) -> (i32, i32, i32) {
    %c0_i32 = arith.constant 0 : i32
    %c0_i32_0 = arith.constant 0 : i32
    %c0_i32_1 = arith.constant 0 : i32
    %c0_i32_2 = arith.constant 0 : i32
    return %c0_i32, %c0_i32_0, %c0_i32_1 : i32, i32, i32
  }
  func.func @transform_8(%arg0: i32) -> (i32, i32, i32) {
    %c0_i32 = arith.constant 0 : i32
    %c0_i32_0 = arith.constant 0 : i32
    %c0_i32_1 = arith.constant 0 : i32
    %c0_i32_2 = arith.constant 0 : i32
    return %c0_i32, %c0_i32_0, %c0_i32_1 : i32, i32, i32
  }
  func.func @transform_9(%arg0: i32) -> (i32, i32, i32) {
    %c0_i32 = arith.constant 0 : i32
    %c0_i32_0 = arith.constant 0 : i32
    %c0_i32_1 = arith.constant 0 : i32
    %c0_i32_2 = arith.constant 0 : i32
    return %c0_i32, %c0_i32_0, %c0_i32_1 : i32, i32, i32
  }
  func.func @transform_10(%arg0: i32) -> (i32, i32, i32) {
    %c0_i32 = arith.constant 0 : i32
    %c0_i32_0 = arith.constant 0 : i32
    %c0_i32_1 = arith.constant 0 : i32
    %c0_i32_2 = arith.constant 0 : i32
    return %c0_i32, %c0_i32_0, %c0_i32_1 : i32, i32, i32
  }
  func.func @transform_11(%arg0: i32) -> (i32, i32) {
    %c0_i32 = arith.constant 0 : i32
    %c0_i32_0 = arith.constant 0 : i32
    %c0_i32_1 = arith.constant 0 : i32
    return %c0_i32, %c0_i32_0 : i32, i32
  }
  func.func @transform_12(%arg0: i32) -> (i32, i32) {
    %c0_i32 = arith.constant 0 : i32
    %c0_i32_0 = arith.constant 0 : i32
    %c0_i32_1 = arith.constant 0 : i32
    return %c0_i32, %c0_i32_0 : i32, i32
  }
  func.func @transform_13(%arg0: i32) -> (i32, i32) {
    %c0_i32 = arith.constant 0 : i32
    %c0_i32_0 = arith.constant 0 : i32
    %c0_i32_1 = arith.constant 0 : i32
    return %c0_i32, %c0_i32_0 : i32, i32
  }
  func.func @transform_14(%arg0: i32) -> (i32, i32) {
    %c0_i32 = arith.constant 0 : i32
    %c0_i32_0 = arith.constant 0 : i32
    %c0_i32_1 = arith.constant 0 : i32
    return %c0_i32, %c0_i32_0 : i32, i32
  }
  func.func @transform_15(%arg0: i32) -> (i32, i32) {
    %c0_i32 = arith.constant 0 : i32
    %c0_i32_0 = arith.constant 0 : i32
    %c0_i32_1 = arith.constant 0 : i32
    return %c0_i32, %c0_i32_0 : i32, i32
  }
  func.func @transform_16(%arg0: i32) -> (i32, i32) {
    %c0_i32 = arith.constant 0 : i32
    %c0_i32_0 = arith.constant 0 : i32
    %c0_i32_1 = arith.constant 0 : i32
    return %c0_i32, %c0_i32_0 : i32, i32
  }
  func.func @transform_17(%arg0: i32) -> (i32, i32, i32) {
    %c0_i32 = arith.constant 0 : i32
    %c0_i32_0 = arith.constant 0 : i32
    %c0_i32_1 = arith.constant 0 : i32
    return %arg0, %c0_i32, %c0_i32_0 : i32, i32, i32
  }
}

</mosaic_0001>

<bundles_post_ra>
// kernel: tpu_custom_call.1
= control target key start
LH: loop header
LB: loop body
LE: loop exit
PB: predicated region body
PF: predicated region fallthrough
CT: control target
= control target key end

     0   :  { %s3481_s0 = inlined_call_operand.hbm [shape: f32[2,8,32], index: 0, kind: input, shape index: {}]   ;;  %s3482_s1 = inlined_call_operand.hbm [shape: f32[1,8,32], index: 1, kind: input, shape index: {}]   ;;  %s3483_s2 = inlined_call_operand.vmem [shape: bf16[2,32,96], index: 2, kind: input, shape index: {}]   ;;  %s3484_s3 = inlined_call_operand.vmem [shape: bf16[2,32,32], index: 3, kind: input, shape index: {}]   ;;  %s3485_s4 = inlined_call_operand.hbm [shape: f32[2,1,32], index: 4, kind: input, shape index: {}]   ;;  %s3486_s5 = inlined_call_operand.hbm [shape: f32[2,1,32], index: 5, kind: input, shape index: {}]   ;;  %s3487_s6 = inlined_call_operand.hbm [shape: f32[2,1,32], index: 6, kind: input, shape index: {}]   ;;  %s3488_s7 = inlined_call_operand.vmem [shape: bf16[2,32,64], index: 7, kind: input, shape index: {}]   ;;  %s3489_s8 = inlined_call_operand.hbm [shape: f32[2,1,64], index: 8, kind: input, shape index: {}]   ;;  %s3490_s9 = inlined_call_operand.vmem [shape: bf16[2,64,32], index: 9, kind: input, shape index: {}]   ;;  %s3491_s10 = inlined_call_operand.hbm [shape: f32[2,1,32], index: 10, kind: input, shape index: {}]   ;;  %s3492_s11 = inlined_call_operand.vmem [shape: f32[1,32], index: 11, kind: input, shape index: {}]   ;;  %s3493_s12 = inlined_call_operand.hbm [shape: f32[1,32], index: 12, kind: input, shape index: {}]   ;;  %s3494_s13 = inlined_call_operand.vmem [shape: f32[1,32], index: 13, kind: input, shape index: {}]   ;;  %s3495_s14 = inlined_call_operand.<no memory space> [shape: f32[1,1], index: 14, kind: input, shape index: {}]   ;;  %s3496_s15 = inlined_call_operand.vmem [shape: bf16[32,128], index: 15, kind: input, shape index: {}]   ;;  %s3497_s16 = inlined_call_operand.vmem [shape: f32[1,128], index: 16, kind: input, shape index: {}]   ;;  %s3498_s17 = inlined_call_operand.hbm [shape: f32[2,1,128], index: 17, kind: output, shape index: {}]  }
   0x1   :  { %3510 = sst [smem:[#allocation24_spill]] %s3481_s0  ;;  %v22_v0 = vstv %s3495_s14 }
   0x2   :  { %3511 = sst [smem:[#allocation25_spill]] %s3482_s1  ;;  %23 = vst [vmem:[#allocation2] sm:$0x1] %v22_v0 }
   0x3   :  { %3512 = sst [smem:[#allocation26_spill]] %s3486_s5 }
   0x4   :  { %3513 = sst [smem:[#allocation27_spill]] %s3490_s9 }
   0x5   :  { %3514 = sst [smem:[#allocation28_spill]] %s3492_s11 }
   0x6   :  { %3515 = sst [smem:[#allocation29_spill]] %s3494_s13 }
   0x7   :  { %3516 = sst [smem:[#allocation30_spill]] %s3496_s15 }
   0x8   :  { %3517 = sst [smem:[#allocation31_spill]] %s3497_s16 }
   0x9   :  { %3518 = sst [smem:[#allocation32_spill]] %s3498_s17 }
   0xa   :  { %24 = vsyncpa [#allocation4], 0 }
   0xb   :  { %26 = vsyncpa [#allocation4 + $0x1], 0 }
   0xc   :  { %27 = vsyncpa [#allocation7], 0 }
   0xd   :  { %28 = vsyncpa [#allocation10], 0 }
   0xe   :  { %29 = vsyncpa [#allocation13], 0 }
   0xf   :  { %30 = vsyncpa [#allocation16], 0 }
  0x10   :  { %31 = vsyncpa [#allocation5], 0 }
  0x11   :  { %33 = vsyncpa [#allocation5 + $0x1], 0  ;;  %s2927_s26 = smov 0   ;;  %s2929_s27 = smov 0  }
  0x12   :  { %s2931_s28 = smov 0   ;;  %s2933_s29 = smov 0  }
  0x13 LB: > { %s2814_s14 = smov [#allocation6]   ;;  %s2948_s30 = sadd.s32 4294967295, %s2812_s29   ;;  %s2812_s29 = sphi %s2933_s29, %s3553_s29   ;;  %s2808_s28 = sphi %s2931_s28, %s3552_s28   ;;  %s2804_s27 = sphi %s2929_s27, %s3551_s27   ;;  %s2800_s26 = sphi %s2927_s26, %s3550_s26  }
  0x14   : > { %s445_s0 = sshll.u32 %s2814_s14, 4  ;;  %p2052_p0 = scmp.ge.s32.totalorder %s2812_s29, 1  ;;  %s446_s0 = int_to_ptr.vmem [resolvable:$true] %s445_s0 }
  0x15   : > { %p3503_p1 = scmp.eq.s32.totalorder %s2948_s30, 0  ;;  %p432_p2 = scmp.lt.s32.totalorder %s2812_s29, 3 }
  0x16   : > { %s2815_s19 = smov [#allocation9]   ;;  %s2816_s21 = smov [#allocation12]  }
  0x17   : > { %p2953_p3 = pnand %p2052_p0, %p432_p2  ;;  %s474_s1 = sshll.u32 %s2815_s19, 4  ;;  %s2966_s1 = int_to_ptr.vmem [resolvable:$true] %s474_s1 }
  0x18   : > { %s503_s22 = sshll.u32 %s2816_s21, 4  ;;  %s3521_s25 = sld [smem:[#allocation25_spill]]  ;;  %s2968_s22 = int_to_ptr.vmem [resolvable:$true] %s503_s22 }
  0x19   : > { %s3519_s18 = scalar_select %p2953_p3, 1, 0 }
  0x1a   : > { %p2355_p5 = pneg %p2953_p3 }
  0x1c   : > { %p2962_p6 = pnand %p2355_p5, %p3503_p1 }
  0x1e   : > { %s2504_s14 = scalar_lea.hbm %s3521_s25, 128  ;;  %p2978_p8 = pneg %p2962_p6 }
  0x1f   : > { %p2505_p7 = scmp.ne.s32.totalorder %s3521_s25, %s2504_s14  ;;  %p2511_p11 = scmp.lt.u32.totalorder %s2504_s14, %s3521_s25 }
  0x21   : > { %p2507_p9 = pnand %p2978_p8, %p2505_p7 }
  0x23   : > { %p2508_p10 = pneg %p2507_p9 }
  0x25   : > { %p2513_p12 = pnand %p2511_p11, %p2508_p10 }
  0x27   : > { %2516 = shalt.err (!%p2513_p12)
}
  0x28   : > { %s2517_s23 = scalar_lea.vmem %s446_s0, 128  ;;  %p2525_p5 = scmp.lt.s32.totalorder %s446_s0, %s446_s0 }
  0x29   : > { %p2518_p13 = scmp.ne.s32.totalorder %s446_s0, %s2517_s23  ;;  %p2526_p4 = scmp.lt.s32.totalorder %s2517_s23, %s2517_s23 }
  0x2b   : > { %p2520_p0 = pnand %p2518_p13, %p2978_p8  ;;  %p2527_p1 = por %p2526_p4, %p2525_p5 }
  0x2d   : > { %p2521_p2 = pneg %p2520_p0 }
  0x2f   : > { %p2528_p3 = pnand %p2527_p1, %p2521_p2 }
  0x31   : > { %2531 = shalt.err (!%p2528_p3)
}
  0x32   : > { %2358 = dma.hbm_to_vmem [thread:$0]  (!%p2962_p6), %s3521_s25, 128, %s446_s0, [#allocation7]  }
  0x33   : > { %s3523_s5 = sld [smem:[#allocation26_spill]] }
  0x39   : > { %s2532_s14 = scalar_lea.hbm %s3523_s5, 32 }
  0x3a   : > { %p2533_p7 = scmp.ne.s32.totalorder %s3523_s5, %s2532_s14  ;;  %p2539_p1 = scmp.lt.u32.totalorder %s2532_s14, %s3523_s5 }
  0x3c   : > { %p2535_p9 = pnand %p2533_p7, %p2978_p8 }
  0x3e   : > { %p2536_p4 = pneg %p2535_p9 }
  0x40   : > { %p2541_p3 = pnand %p2539_p1, %p2536_p4 }
  0x42   : > { %2544 = shalt.err (!%p2541_p3)
}
  0x43   : > { %s2545_s0 = scalar_lea.vmem %s2966_s1, 32  ;;  %p2553_p13 = scmp.lt.s32.totalorder %s2966_s1, %s2966_s1 }
  0x44   : > { %p2546_p10 = scmp.ne.s32.totalorder %s2966_s1, %s2545_s0  ;;  %p2554_p0 = scmp.lt.s32.totalorder %s2545_s0, %s2545_s0 }
  0x46   : > { %p2548_p11 = pnand %p2546_p10, %p2978_p8  ;;  %p2555_p2 = por %p2554_p0, %p2553_p13 }
  0x48   : > { %p2549_p12 = pneg %p2548_p11 }
  0x4a   : > { %p2556_p5 = pnand %p2555_p2, %p2549_p12 }
  0x4c   : > { %2559 = shalt.err (!%p2556_p5)
}
  0x4d   : > { %s2817_s13 = smov 16   ;;  %s2818_s11 = smov 1  }
  0x4e   : > { %2364 = dma.hbm_to_vmem [thread:$0]  (!%p2962_p6), %s3523_s5, 32, %s2966_s1, [#allocation10], %s2817_s13, %s2817_s13, %s2818_s11  }
  0x4f   : > { %s2560_s14 = scalar_lea.hbm %s3489_s8, 32 }
  0x50   : > { %p2561_p7 = scmp.ne.s32.totalorder %s3489_s8, %s2560_s14  ;;  %p2567_p1 = scmp.lt.u32.totalorder %s2560_s14, %s3489_s8 }
  0x52   : > { %p2563_p9 = pnand %p2561_p7, %p2978_p8 }
  0x54   : > { %p2564_p4 = pneg %p2563_p9 }
  0x56   : > { %p2569_p3 = pnand %p2567_p1, %p2564_p4 }
  0x58   : > { %2572 = shalt.err (!%p2569_p3)
}
  0x59   : > { %s2573_s1 = scalar_lea.vmem %s2968_s22, 32  ;;  %p2581_p13 = scmp.lt.s32.totalorder %s2968_s22, %s2968_s22 }
  0x5a   : > { %p2574_p10 = scmp.ne.s32.totalorder %s2968_s22, %s2573_s1  ;;  %p2582_p0 = scmp.lt.s32.totalorder %s2573_s1, %s2573_s1 }
  0x5c   : > { %p2576_p11 = pnand %p2574_p10, %p2978_p8  ;;  %p2583_p2 = por %p2582_p0, %p2581_p13 }
  0x5e   : > { %p2577_p12 = pneg %p2576_p11 }
  0x60   : > { %p2584_p5 = pnand %p2583_p2, %p2577_p12 }
  0x62   : > { %2587 = shalt.err (!%p2584_p5)
}
  0x63   : > { %2370 = dma.hbm_to_vmem [thread:$0]  (!%p2962_p6), %s3489_s8, 32, %s2968_s22, [#allocation13], %s2817_s13, %s2817_s13, %s2818_s11  }
  0x64   : > { %s2819_s17 = smov [#allocation8]   ;;  %s2820_s24 = smov [#allocation11]  }
  0x65   : > { %s461_s15 = sshll.u32 %s2819_s17, 4  ;;  %s487_s14 = sshll.u32 %s2820_s24, 4  ;;  %s462_s15 = int_to_ptr.vmem [resolvable:$true] %s461_s15  ;;  %s488_s14 = int_to_ptr.vmem [resolvable:$true] %s487_s14 }
  0x66   : > { %s2588_s0 = scalar_lea.hbm %s3485_s4, 32 }
  0x67   : > { %p2589_p7 = scmp.ne.s32.totalorder %s3485_s4, %s2588_s0  ;;  %p2595_p1 = scmp.lt.u32.totalorder %s2588_s0, %s3485_s4 }
  0x69   : > { %p2591_p9 = pnand %p2589_p7, %p2978_p8 }
  0x6b   : > { %p2592_p4 = pneg %p2591_p9 }
  0x6d   : > { %p2597_p3 = pnand %p2595_p1, %p2592_p4 }
  0x6f   : > { %2600 = shalt.err (!%p2597_p3)
}
  0x70   : > { %s2601_s22 = scalar_lea.vmem %s462_s15, 32  ;;  %p2609_p13 = scmp.lt.s32.totalorder %s462_s15, %s462_s15 }
  0x71   : > { %p2602_p10 = scmp.ne.s32.totalorder %s462_s15, %s2601_s22  ;;  %p2610_p0 = scmp.lt.s32.totalorder %s2601_s22, %s2601_s22 }
  0x73   : > { %p2604_p11 = pnand %p2602_p10, %p2978_p8  ;;  %p2611_p2 = por %p2610_p0, %p2609_p13 }
  0x75   : > { %p2605_p12 = pneg %p2604_p11 }
  0x77   : > { %p2612_p5 = pnand %p2611_p2, %p2605_p12 }
  0x79   : > { %2615 = shalt.err (!%p2612_p5)
}
  0x7a   : > { %2361 = dma.hbm_to_vmem [thread:$0]  (!%p2962_p6), %s3485_s4, 32, %s462_s15, [#allocation7], %s2817_s13, %s2817_s13, %s2818_s11  }
  0x7b   : > { %s2616_s24 = scalar_lea.hbm %s3487_s6, 32 }
  0x7c   : > { %p2617_p7 = scmp.ne.s32.totalorder %s3487_s6, %s2616_s24  ;;  %p2623_p1 = scmp.lt.u32.totalorder %s2616_s24, %s3487_s6 }
  0x7e   : > { %p2619_p9 = pnand %p2617_p7, %p2978_p8 }
  0x80   : > { %p2620_p4 = pneg %p2619_p9 }
  0x82   : > { %p2625_p3 = pnand %p2623_p1, %p2620_p4 }
  0x84   : > { %2628 = shalt.err (!%p2625_p3)
}
  0x85   : > { %s2629_s25 = scalar_lea.vmem %s488_s14, 32  ;;  %p2637_p13 = scmp.lt.s32.totalorder %s488_s14, %s488_s14 }
  0x86   : > { %p2630_p10 = scmp.ne.s32.totalorder %s488_s14, %s2629_s25  ;;  %p2638_p0 = scmp.lt.s32.totalorder %s2629_s25, %s2629_s25 }
  0x88   : > { %p2632_p11 = pnand %p2630_p10, %p2978_p8  ;;  %p2639_p2 = por %p2638_p0, %p2637_p13 }
  0x8a   : > { %p2633_p12 = pneg %p2632_p11 }
  0x8c   : > { %p2640_p5 = pnand %p2639_p2, %p2633_p12 }
  0x8e   : > { %2643 = shalt.err (!%p2640_p5)
}
  0x8f   : > { %2367 = dma.hbm_to_vmem [thread:$0]  (!%p2962_p6), %s3487_s6, 32, %s488_s14, [#allocation10], %s2817_s13, %s2817_s13, %s2818_s11  }
  0x90   : > { %s2821_s5 = smov [#allocation14]   ;;  %s2822_s16 = smov [#allocation15]  }
  0x91   : > { %s519_s9 = sshll.u32 %s2821_s5, 4  ;;  %s536_s17 = sshll.u32 %s2822_s16, 4  ;;  %s520_s9 = int_to_ptr.vmem [resolvable:$true] %s519_s9  ;;  %s537_s17 = int_to_ptr.vmem [resolvable:$true] %s536_s17 }
  0x92   : > { %s2644_s23 = scalar_lea.hbm %s3491_s10, 32 }
  0x93   : > { %p2645_p7 = scmp.ne.s32.totalorder %s3491_s10, %s2644_s23  ;;  %p2651_p1 = scmp.lt.u32.totalorder %s2644_s23, %s3491_s10 }
  0x95   : > { %p2647_p9 = pnand %p2645_p7, %p2978_p8 }
  0x97   : > { %p2648_p4 = pneg %p2647_p9 }
  0x99   : > { %p2653_p3 = pnand %p2651_p1, %p2648_p4 }
  0x9b   : > { %2656 = shalt.err (!%p2653_p3)
}
  0x9c   : > { %s2657_s14 = scalar_lea.vmem %s520_s9, 32  ;;  %p2665_p13 = scmp.lt.s32.totalorder %s520_s9, %s520_s9 }
  0x9d   : > { %p2658_p10 = scmp.ne.s32.totalorder %s520_s9, %s2657_s14  ;;  %p2666_p0 = scmp.lt.s32.totalorder %s2657_s14, %s2657_s14 }
  0x9f   : > { %p2660_p11 = pnand %p2658_p10, %p2978_p8  ;;  %p2667_p2 = por %p2666_p0, %p2665_p13 }
  0xa1   : > { %p2661_p12 = pneg %p2660_p11 }
  0xa3   : > { %p2668_p5 = pnand %p2667_p2, %p2661_p12 }
  0xa5   : > { %2671 = shalt.err (!%p2668_p5)
}
  0xa6   : > { %2373 = dma.hbm_to_vmem [thread:$0]  (!%p2962_p6), %s3491_s10, 32, %s520_s9, [#allocation13], %s2817_s13, %s2817_s13, %s2818_s11  }
  0xa7   : > { %s2672_s21 = scalar_lea.hbm %s3493_s12, 16 }
  0xa8   : > { %p2673_p7 = scmp.ne.s32.totalorder %s3493_s12, %s2672_s21  ;;  %p2679_p1 = scmp.lt.u32.totalorder %s2672_s21, %s3493_s12 }
  0xaa   : > { %p2675_p9 = pnand %p2673_p7, %p2978_p8 }
  0xac   : > { %p2676_p4 = pneg %p2675_p9 }
  0xae   : > { %p2681_p3 = pnand %p2679_p1, %p2676_p4 }
  0xb0   : > { %2684 = shalt.err (!%p2681_p3)
}
  0xb1   : > { %s2685_s15 = scalar_lea.vmem %s537_s17, 16  ;;  %s2692_s13 = scalar_lea.vmem %s537_s17, 32 }
  0xb2   : > { %p2686_p10 = scmp.ne.s32.totalorder %s537_s17, %s2685_s15  ;;  %p2693_p13 = scmp.lt.s32.totalorder %s537_s17, %s537_s17 }
  0xb3   : > { %p2694_p0 = scmp.lt.s32.totalorder %s2692_s13, %s2685_s15 }
  0xb4   : > { %p2688_p11 = pnand %p2686_p10, %p2978_p8 }
  0xb5   : > { %p2695_p2 = por %p2694_p0, %p2693_p13 }
  0xb6   : > { %p2689_p12 = pneg %p2688_p11 }
  0xb8   : > { %p2696_p5 = pnand %p2695_p2, %p2689_p12 }
  0xba   : > { %2699 = shalt.err (!%p2696_p5)
}
  0xbb   : > { %2376 = dma.hbm_to_vmem [thread:$0]  (!%p2962_p6), %s3493_s12, 16, %s537_s17, [#allocation16]  }
  0xbc   : > { %s2051_s19 = sadd.s32 4294967294, %s2812_s29   ;;  %s3129_s20 = sadd.s32 1, %s2812_s29  }
  0xbd   : > { %s46_s14 = sadd.s32 1, %s2808_s28  ;;  %s43_s22 = ssub.s32 %s2812_s29, %s3129_s20 }
  0xbe   : > { %p53_p8 = scmp.ne.s32.totalorder %s2808_s28, %s2804_s27  ;;  %p44_p7 = scmp.eq.s32.totalorder %s43_s22, 0 }
  0xbf   : > { %p54_p9 = scmp.eq.s32.totalorder %s2812_s29, 0  ;;  %p59_p4 = scmp.ne.s32.totalorder %s2804_s27, %s2800_s26 }
  0xc0   : > { %p419_p1 = scmp.eq.s32.totalorder %s2948_s30, 1  ;;  %p3524_p10 = scmp.eq.s32.totalorder %s2948_s30, 0 }
  0xc1   : > { %s3141_s5 = scalar_select %p44_p7, %s2808_s28, %s46_s14  }
  0xc2   : > { %p55_p3 = por %p54_p9, %p53_p8  ;;  %p3145_p11 = por %p3524_p10, %p59_p4 }
  0xc3   : > { %p3149_p6 = por %p419_p1, %p53_p8  ;;  %p425_p12 = scmp.eq.s32.totalorder %s2051_s19, 1 }
  0xc4   : > { %p2392_p13 = scmp.lt.s32.totalorder %s2812_s29, 2  ;;  %s559_s24 = sand.u32 1, %s2808_s28  }
  0xc5   : > { %s3526_s17 = scalar_select %p3149_p6, 1, 0 }
  0xc6   : > { %p3155_p0 = por %p425_p12, %p59_p4  ;;  %s2061_s23 = sshll.u32 %s559_s24, 3 }
  0xc7   : > { %s2062_s0 = sshll.u32 %s2812_s29, 7  ;;  %s3528_s15 = sld [smem:[#allocation24_spill]] }
  0xc8   : > { %s3527_s21 = scalar_select %p3155_p0, 1, 0 }
  0xc9   : > { %s563_s11 = scalar_lea.vmem [#allocation3], %s2061_s23  ;;  %p3165_p2 = pnand %p2392_p13, %p55_p3 }
  0xca   : > { %s570_s9 = sshll.u32 %s563_s11, 4  ;;  %s560_s14 = scalar_lea.sflag [#allocation4], %s559_s24  ;;  %s3169_s9 = int_to_ptr.vmem [resolvable:$true] %s570_s9 }
  0xcb   : > { %p2702_p8 = pneg %p3165_p2 }
  0xcd   : > { %s3163_s13 = scalar_lea.hbm %s3528_s15, %s2062_s0  ;;  %s2705_s1 = scalar_lea.hbm %s3528_s15, 256 }
  0xce   : > { %s2700_s22 = scalar_lea.hbm %s3163_s13, 128  ;;  %p2706_p4 = scmp.lt.u32.totalorder %s3163_s13, %s3528_s15 }
  0xcf   : > { %p2701_p5 = scmp.ne.s32.totalorder %s3163_s13, %s2700_s22  ;;  %p2707_p1 = scmp.lt.u32.totalorder %s2705_s1, %s2700_s22 }
  0xd0   : > { %p2709_p10 = scmp.lt.u32.totalorder %s2700_s22, %s3163_s13 }
  0xd1   : > { %p2703_p7 = pnand %p2702_p8, %p2701_p5  ;;  %p2708_p3 = por %p2707_p1, %p2706_p4 }
  0xd3   : > { %p2704_p9 = pneg %p2703_p7  ;;  %p2710_p12 = por %p2709_p10, %p2708_p3 }
  0xd5   : > { %p2711_p13 = pnand %p2710_p12, %p2704_p9 }
  0xd7   : > { %2714 = shalt.err (!%p2711_p13)
}
  0xd8   : > { %s2715_s24 = scalar_lea.vmem %s3169_s9, 128  ;;  %s2823_s0 = smov [#allocation3]  }
  0xd9   : > { %p2716_p5 = scmp.ne.s32.totalorder %s3169_s9, %s2715_s24  ;;  %s2720_s23 = sshll.u32 %s2823_s0, 4  ;;  %s2721_s23 = int_to_ptr.vmem [resolvable:$false] %s2720_s23 }
  0xda   : > { %s2722_s25 = scalar_lea.vmem %s2721_s23, 256  ;;  %p2723_p6 = scmp.lt.s32.totalorder %s3169_s9, %s2721_s23 }
  0xdb   : > { %p2718_p7 = pnand %p2716_p5, %p2702_p8  ;;  %p2724_p4 = scmp.lt.s32.totalorder %s2722_s25, %s2715_s24 }
  0xdd   : > { %p2719_p0 = pneg %p2718_p7  ;;  %p2725_p1 = por %p2724_p4, %p2723_p6 }
  0xdf   : > { %p2726_p3 = pnand %p2725_p1, %p2719_p0 }
  0xe1   : > { %2729 = shalt.err (!%p2726_p3)
}
  0xe2   : > { %2380 = dma.hbm_to_vmem [thread:$0]  (!%p3165_p2), %s3163_s13, 128, %s3169_s9, %s560_s14  }
  0xe3   : > { %p3530_p9 = scmp.ne.s32.totalorder %s3519_s18, 0 }
  0xe4   : > { %s3199_s22 = sand.u32 (!%p3530_p9), 1, %s2804_s27  }
  0xe5   : > { %579 = sbr.rel (%p3530_p9) target bundleno = 5515 (0x158b), region = 88  ;;  %s2064_s1 = sshll.u32 (!%p3530_p9), %s3199_s22, 3 }
  0xe6   : > { %s582_s11 = scalar_lea.sflag (!%p3530_p9), [#allocation4], %s3199_s22  ;;  %s585_s24 = scalar_lea.vmem (!%p3530_p9), [#allocation3], %s2064_s1 }
  0xec   : > { %2775 = dma.done.wait (%p3145_p11), %s582_s11, 128  }
  0xed   : > { %2777 = vsyncadd (%p3145_p11), %s582_s11, 4294967168  ;;  %p3531_p6 = scmp.eq.s32.totalorder %s2948_s30, 0 }
  0xef   : > { %2779 = dma.done.wait (%p3531_p6), [#allocation7], 160   ;;  %p3532_p0 = pmov %p3531_p6 }
  0xf1   : > { %2781 = vsyncadd (%p3532_p0), [#allocation7], 4294967136  ;;  %p3533_p2 = pmov %p3532_p0 }
  0xf2   : > { %p3534_p8 = pmov %p3532_p0 }
  0xf3   : > { %2783 = dma.done.wait (%p3533_p2), [#allocation10], 64  }
  0xf4   : > { %2785 = vsyncadd (%p3534_p8), [#allocation10], 4294967232  ;;  %p3535_p10 = pmov %p3532_p0 }
  0xf5   : > { %p3536_p12 = pmov %p3532_p0 }
  0xf6   : > { %2787 = dma.done.wait (%p3535_p10), [#allocation13], 64  }
  0xf7   : > { %2789 = vsyncadd (%p3536_p12), [#allocation13], 4294967232  ;;  %p3537_p11 = pmov %p3532_p0 }
  0xf8   : > { %p3538_p13 = pmov %p3532_p0 }
  0xf9   : > { %2791 = dma.done.wait (%p3537_p11), [#allocation16], 16  }
  0xfa   : > { %2793 = vsyncadd (%p3538_p13), [#allocation16], 4294967280  ;;  %v2824_v1 = vmov 0.0   ;;  %vm2825_vm0 = vmmov 0   ;;  %v2452_v2 = vld [vmem:[%s3483_s2] sm:$0xff]   ;;  %v2453_v3 = vld [vmem:[%s3483_s2 + $0x8] sm:$0xff]  }
  0xfb   : > { %2195 = vmatprep.subr.bf16.mxu0 %v2824_v1  ;;  %2199 = vmatprep.mubr.msk.bf16.mxu0 %vm2825_vm0, %v2824_v1  ;;  %v664_v4 = vld [vmem:[%s585_s24] sm:$0xff]  ;;  %v665_v5 = vld [vmem:[#allocation6] sm:$0xff]  ;;  %vm684_vm1 = vcmask 261120   ;;  %s2826_s19 = smov 112   ;;  %s2827_s14 = smov 96   ;;  %vm732_vm2 = vcmask 130048  }
  0xfc   : > { %2203 = vmatprep.subr.bf16.mxu1 %v2824_v1  ;;  %2205 = vmatprep.mubr.msk.bf16.mxu1 %vm2825_vm0, %v2824_v1  ;;  %v3236_v6 = vadd.f32 %v665_v5, %v664_v4  ;;  %s2828_s0 = smov 80   ;;  %vm779_vm3 = vcmask 64512   ;;  %s2829_s23 = smov 64   ;;  %vm797_vm4 = vcmask 1043456   ;;  %v2454_v50 = vld [vmem:[%s3484_s3] sm:$0xff]   ;;  %v2455_v51 = vld [vmem:[%s3484_s3 + $0x8] sm:$0xff]  }
  0xfd   : > { %2196 = vmatpush3.bf16.msra.mxu0 %v2452_v2  ;;  %s3509_s25 = smov 48   ;;  %s3508_s16 = smov 16   ;;  %v2082_v0 = vld [vmem:[#allocation8] ss:$0 sm:$0xff]  ;;  %vm1160_vm5 = vcmask 523264   ;;  %vm1810_vm6 = vcmask 7168  }
  0xfe   : > { %2197 = vmatprep.subr.bf16.mxu0 %v2824_v1  ;;  %v667_v7 = vpack.c.bf16 %v3236_v6, %v3236_v6  ;;  %s3539_s13 = sld [smem:[#allocation27_spill]]  ;;  %s3541_s11 = smov 16  }
  0xff   : > { %s3542_s18 = sld [smem:[#allocation28_spill]]  ;;  %s3544_s1 = sld [smem:[#allocation30_spill]] }
 0x100   : > { %s2145_s9 = sshll.u32 %s2948_s30, 4  ;;  %p3547_p7 = scmp.ne.s32.totalorder %s3526_s17, 0 }
 0x101   : > { %2198 = vmatpush3.bf16.msra.mxu0 %v2453_v3 }
 0x102   : > { %2209 = vmatprep.subr.bf16.mxu0 %v2824_v1 }
 0x104   : > { %2200 = vmatmul.mubr.msk.bf16.vlgmr.msra.gmra.mrb[0].mxu0 %vm684_vm1, %v667_v7 }
 0x105   : > { %2211 = vmatprep.mubr.msk.bf16.mxu0 %vm2825_vm0, %v2824_v1 }
 0x1d7   : > { %v722_v8 = vpop.f32.mrb[0].mxu0 }
 0x1d8   : > { %v728_v9 = vpack.c.bf16 %v722_v8, %v722_v8  ;;  %v2201_v10 = vpop.f32.mrb[1].mxu0 }
 0x1d9   : > { %v725_v11 = vpop.f32.mrb[2].mxu0 }
 0x1da   : > { %841 = vrot.lane.b32.xlu1 %v728_v9, %s2826_s19  ;;  %730 = vrot.lane.b32.xlu0 %v728_v9, %s2827_s14  ;;  %v2202_v12 = vpop.f32.mrb[3].mxu0 }
 0x1de   : > { %843 = vrot.lane.b32.xlu0 %v728_v9, %s2828_s0 }
 0x24c   : > { %v731_v13 = vpop.permute.xlu0 %730  ;;  %v842_v17 = vpop.permute.xlu1 %841 }
 0x24d   : > { %v737_v14 = vsel %vm732_vm2, %v731_v13, 0 }
 0x24e   : > { %2204 = vmatpush3.bf16.xpose.msra.mxu1 %v737_v14  ;;  %v2457_v14 = vld [vmem:[%s3488_s7 + $0x8] sm:$0xff]  }
 0x24f   : > { %2215 = vmatprep.subr.bf16.mxu1 %v2824_v1 }
 0x250   : > { %v844_v15 = vpop.permute.xlu0 %843 }
 0x251   : > { %v849_v16 = vsel %vm732_vm2, %v844_v15, 0 }
 0x255   : > { %2206 = vmatmul.mubr.msk.bf16.vlgmr.msra.gmra.mrb[0].mxu1 %vm732_vm2, %v728_v9 }
 0x256   : > { %2216 = vmatpush3.bf16.xpose.msra.mxu1 %v849_v16  ;;  %2217 = vmatprep.mubr.msk.bf16.mxu1 %vm2825_vm0, %v2824_v1 }
 0x257   : > { %2227 = vmatprep.subr.bf16.mxu1 %v2824_v1 }
 0x25d   : > { %2218 = vmatmul.mubr.msk.bf16.vlgmr.msra.gmra.mrb[4].mxu1 %vm732_vm2, %v842_v17 }
 0x25e   : > { %2231 = vmatprep.mubr.msk.bf16.mxu1 %vm2825_vm0, %v2824_v1  ;;  %2228 = vmatpush3.bf16.msra.mxu1 %v2454_v50 }
 0x25f   : > { %2229 = vmatprep.subr.bf16.mxu1 %v2824_v1 }
 0x262   : > { %2230 = vmatpush3.bf16.msra.mxu1 %v2455_v51 }
 0x263   : > { %2243 = vmatprep.subr.bf16.mxu1 %v2824_v1 }
 0x328   : > { %v773_v18 = vpop.f32.mrb[0].mxu1 }
 0x329   : > { %v2207_v19 = vpop.f32.mrb[1].mxu1  ;;  %v780_v20 = vsel %vm779_vm3, %v773_v18, -inf }
 0x32a   : > { %781 = vmax.xlane.f32.xlu1 %v780_v20  ;;  %v776_v21 = vpop.f32.mrb[2].mxu1  ;;  %v2083_v19 = vld [vmem:[#allocation9] ss:$0 sm:$0xff] }
 0x32b   : > { %v2208_v22 = vpop.f32.mrb[3].mxu1  ;;  %v2084_v21 = vld [vmem:[#allocation11] ss:$0 sm:$0xff] }
 0x330   : > { %v885_v23 = vpop.f32.mrb[4].mxu1 }
 0x331   : > { %v2219_v24 = vpop.f32.mrb[5].mxu1  ;;  %v891_v25 = vsel %vm779_vm3, %v885_v23, -inf }
 0x332   : > { %892 = vmax.xlane.f32.xlu0 %v891_v25  ;;  %v888_v26 = vpop.f32.mrb[6].mxu1  ;;  %v2458_v25 = vld [vmem:[%s3539_s13] sm:$0xff]  }
 0x333   : > { %v2220_v27 = vpop.f32.mrb[7].mxu1  ;;  %v2459_v26 = vld [vmem:[%s3539_s13 + $0x8] sm:$0xff]  }
 0x334   : > { %v2460_v27 = vld [vmem:[%s3539_s13 + $0x10] sm:$0xff]  }
 0x3b7   : > { %v782_v28 = vpop.xlane.xlu1 %781 }
 0x3b8   : > { %v783_v29 = vsub.f32 %v773_v18, %v782_v28  ;;  %v2461_v28 = vld [vmem:[%s3539_s13 + $0x18] sm:$0xff]  }
 0x3ba   : > { %v784_v30 = vmul.f32 1.442695, %v783_v29  ;;  %v2085_v29 = vld [vmem:[#allocation12] ss:$0 sm:$0xff] }
 0x3bc   : > { %2474 = vpow2.f32 %v784_v30 }
 0x3bf   : > { %v893_v31 = vpop.xlane.xlu0 %892 }
 0x3c0   : > { %v894_v32 = vsub.f32 %v885_v23, %v893_v31 }
 0x3c2   : > { %v895_v33 = vmul.f32 1.442695, %v894_v32 }
 0x3c4   : > { %2476 = vpow2.f32 %v895_v33 }
 0x3c6   : > { %v2475_v34 = vpop.eup %2474 }
 0x3c7   : > { %v786_v35 = vsel %vm779_vm3, %v2475_v34, 0.0 }
 0x3c8   : > { %787 = vadd.xlane.f32.xlu0 %v786_v35 }
 0x3ce   : > { %v2477_v36 = vpop.eup %2476 }
 0x3cf   : > { %v897_v37 = vsel %vm779_vm3, %v2477_v36, 0.0 }
 0x3d0   : > { %898 = vadd.xlane.f32.xlu1 %v897_v37 }
 0x3de   : > { %792 = vrot.lane.b32.xlu0 %v728_v9, %s2829_s23 }
 0x3e1   : > { %903 = vrot.lane.b32.xlu1 %v728_v9, %s3509_s25  ;;  %s1906_s25 = scalar_lea.sflag [#allocation5], %s3199_s22 }
 0x455   : > { %v788_v38 = vpop.xlane.xlu0 %787 }
 0x456   : > { %2478 = vrcp.f32 %v788_v38 }
 0x459   : > { %v793_v39 = vpop.permute.xlu0 %792 }
 0x45a   : > { %v799_v40 = vsel %vm797_vm4, %v793_v39, 0 }
 0x45b   : > { %2210 = vmatpush3.bf16.msra.mxu0 %v799_v40 }
 0x45c   : > { %2221 = vmatprep.subr.bf16.mxu0 %v2824_v1 }
 0x45d   : > { %v899_v41 = vpop.xlane.xlu1 %898 }
 0x45e   : > { %2480 = vrcp.f32 %v899_v41  ;;  %v2462_v41 = vld [vmem:[%s3483_s2 + $0x10] sm:$0xff]  }
 0x460   : > { %v2479_v42 = vpop.eup %2478 }
 0x461   : > { %v790_v43 = vmul.f32 %v2479_v42, %v2475_v34  ;;  %v904_v44 = vpop.permute.xlu1 %903  ;;  %v2463_v42 = vld [vmem:[%s3483_s2 + $0x18] sm:$0xff]  }
 0x462   : > { %v909_v46 = vsel %vm797_vm4, %v904_v44, 0  ;;  %v2094_v44 = vld [vmem:[#allocation14] ss:$0 sm:$0xff] }
 0x463   : > { %v791_v45 = vpack.c.bf16 %v790_v43, %v790_v43 }
 0x465   : > { %2212 = vmatmul.mubr.msk.bf16.vlgmr.msra.gmra.mrb[4].mxu0 %vm779_vm3, %v791_v45 }
 0x466   : > { %2222 = vmatpush3.bf16.msra.mxu0 %v909_v46  ;;  %2223 = vmatprep.mubr.msk.bf16.mxu0 %vm2825_vm0, %v2824_v1 }
 0x467   : > { %2235 = vmatprep.subr.bf16.mxu0 %v2824_v1 }
 0x468   : > { %v2481_v47 = vpop.eup %2480 }
 0x469   : > { %v901_v48 = vmul.f32 %v2481_v47, %v2477_v36 }
 0x46b   : > { %v902_v49 = vpack.c.bf16 %v901_v48, %v901_v48 }
 0x46d   : > { %2224 = vmatmul.mubr.msk.bf16.vlgmr.msra.gmra.mrb[8].mxu0 %vm779_vm3, %v902_v49 }
 0x46e   : > { %2239 = vmatprep.mubr.msk.bf16.mxu0 %vm2825_vm0, %v2824_v1 }
 0x538   : > { %v835_v52 = vpop.f32.mrb[4].mxu0 }
 0x539   : > { %v2213_v53 = vpop.f32.mrb[5].mxu0 }
 0x53a   : > { %v838_v54 = vpop.f32.mrb[6].mxu0 }
 0x53b   : > { %v2214_v55 = vpop.f32.mrb[7].mxu0 }
 0x540   : > { %v945_v56 = vpop.f32.mrb[8].mxu0 }
 0x541   : > { %952 = vrot.lane.b32.xlu1 %v945_v56, %s3508_s16  ;;  %v2225_v57 = vpop.f32.mrb[9].mxu0  ;;  %s2833_s16 = smov [#allocation17]  }
 0x542   : > { %v948_v58 = vpop.f32.mrb[10].mxu0 }
 0x543   : > { %v2226_v59 = vpop.f32.mrb[11].mxu0 }
 0x5b3   : > { %v953_v60 = vpop.permute.xlu1 %952 }
 0x5b4   : > { %v955_v61 = vsel %vm732_vm2, %v835_v52, %v953_v60 }
 0x5b5   : > { %v956_v62 = vpack.c.bf16 %v955_v61, %v955_v61 }
 0x5b7   : > { %2232 = vmatmul.mubr.msk.bf16.vlgmr.msra.gmra.mrb[8].mxu1 %vm684_vm1, %v956_v62 }
 0x5b8   : > { %2251 = vmatprep.mubr.msk.bf16.mxu1 %vm2825_vm0, %v2824_v1  ;;  %2244 = vmatpush3.bf16.msra.mxu1 %v2458_v25 }
 0x5b9   : > { %2245 = vmatprep.subr.bf16.mxu1 %v2824_v1 }
 0x5bc   : > { %2246 = vmatpush3.bf16.msra.mxu1 %v2459_v26 }
 0x5bd   : > { %2247 = vmatprep.subr.bf16.mxu1 %v2824_v1 }
 0x5c0   : > { %2248 = vmatpush3.bf16.msra.mxu1 %v2460_v27 }
 0x5c1   : > { %2249 = vmatprep.subr.bf16.mxu1 %v2824_v1 }
 0x5c4   : > { %2250 = vmatpush3.bf16.msra.mxu1 %v2461_v28 }
 0x5c5   : > { %2269 = vmatprep.subr.bf16.mxu1 %v2824_v1 }
 0x68a   : > { %v1010_v63 = vpop.f32.mrb[8].mxu1 }
 0x68b   : > { %v1016_v2 = vadd.f32 %v1010_v63, %v3236_v6  ;;  %v2233_v3 = vpop.f32.mrb[9].mxu1  ;;  %v2456_v6 = vld [vmem:[%s3488_s7] sm:$0xff]  }
 0x68c   : > { %v1013_v4 = vpop.f32.mrb[10].mxu1  ;;  %2236 = vmatpush3.bf16.msra.mxu0 %v2456_v6 }
 0x68d   : > { %v3287_v5 = vadd.f32 %v2082_v0, %v1016_v2  ;;  %v2234_v7 = vpop.f32.mrb[11].mxu1  ;;  %2237 = vmatprep.subr.bf16.mxu0 %v2824_v1 }
 0x68f   : > { %v1027_v8 = vsel %vm684_vm1, %v3287_v5, 0.0 }
 0x690   : > { %1028 = vadd.xlane.f32.xlu0 %v1027_v8  ;;  %2238 = vmatpush3.bf16.msra.mxu0 %v2457_v14 }
 0x691   : > { %2255 = vmatprep.subr.bf16.mxu0 %v2824_v1 }
 0x71d   : > { %v1029_v9 = vpop.xlane.xlu0 %1028 }
 0x71e   : > { %v1031_v10 = vmul.f32 0.03125, %v1029_v9 }
 0x720   : > { %v1032_v11 = vsub.f32 %v3287_v5, %v1031_v10 }
 0x722   : > { %v1033_v12 = vmul.f32 %v1032_v11, %v1032_v11 }
 0x724   : > { %v1034_v13 = vsel %vm684_vm1, %v1033_v12, 0.0 }
 0x725   : > { %1035 = vadd.xlane.f32.xlu1 %v1034_v13 }
 0x7b2   : > { %v1036_v15 = vpop.xlane.xlu1 %1035 }
 0x7b3   : > { %v1037_v16 = vmul.f32 0.03125, %v1036_v15 }
 0x7b5   : > { %v1038_v17 = vadd.f32 1e-05, %v1037_v16 }
 0x7b7   : > { %2482 = vrsqrt.f32 %v1038_v17 }
 0x7c1   : > { %v2483_v18 = vpop.eup %2482 }
 0x7c2   : > { %v1040_v20 = vmul.f32 %v2483_v18, %v1032_v11 }
 0x7c4   : > { %v1047_v22 = vmul.f32 %v2083_v19, %v1040_v20 }
 0x7c6   : > { %v1054_v23 = vadd.f32 %v2084_v21, %v1047_v22 }
 0x7c8   : > { %v1055_v24 = vpack.c.bf16 %v1054_v23, %v1054_v23 }
 0x7ca   : > { %2240 = vmatmul.mubr.msk.bf16.vlgmr.msra.gmra.mrb[12].mxu0 %vm684_vm1, %v1055_v24 }
 0x7cb   : > { %2259 = vmatprep.mubr.msk.bf16.mxu0 %vm2825_vm0, %v2824_v1  ;;  %2256 = vmatpush3.bf16.msra.mxu0 %v2462_v41 }
 0x7cc   : > { %2257 = vmatprep.subr.bf16.mxu0 %v2824_v1 }
 0x7cf   : > { %2258 = vmatpush3.bf16.msra.mxu0 %v2463_v42 }
 0x7d0   : > { %2263 = vmatprep.subr.bf16.mxu0 %v2824_v1 }
 0x89d   : > { %v1116_v30 = vpop.f32.mrb[12].mxu0 }
 0x89e   : > { %v1117_v31 = vadd.f32 %v2085_v29, %v1116_v30  ;;  %v2241_v32 = vpop.f32.mrb[13].mxu0  ;;  %v2464_v30 = vld [vmem:[%s3484_s3 + $0x10] sm:$0xff]  }
 0x89f   : > { %v1119_v33 = vpop.f32.mrb[14].mxu0 }
 0x8a0   : > { %v1123_v34 = vmul.f32 0.70710677, %v1117_v31  ;;  %v2242_v35 = vpop.f32.mrb[15].mxu0  ;;  %v1122_v37 = vmul.f32 0.5, %v1117_v31  ;;  %v2465_v31 = vld [vmem:[%s3484_s3 + $0x18] sm:$0xff]  }
 0x8a2   : > { %2484 = verf.f32 %v1123_v34 }
 0x8ac   : > { %v2485_v36 = vpop.eup %2484 }
 0x8ad   : > { %v1125_v38 = vadd.f32 1.0, %v2485_v36 }
 0x8af   : > { %v1126_v39 = vmul.f32 %v1125_v38, %v1122_v37 }
 0x8b1   : > { %v1127_v40 = vpack.c.bf16 %v1126_v39, %v1126_v39 }
 0x8b3   : > { %2252 = vmatmul.mubr.msk.bf16.vlgmr.msra.gmra.mrb[12].mxu1 %vm1160_vm5, %v1127_v40 }
 0x8b4   : > { %2271 = vmatprep.mubr.msk.bf16.mxu1 %vm2825_vm0, %v2824_v1 }
 0x986   : > { %v1198_v43 = vpop.f32.mrb[12].mxu1 }
 0x987   : > { %v1204_v45 = vadd.f32 %v1198_v43, %v3287_v5  ;;  %v2253_v46 = vpop.f32.mrb[13].mxu1 }
 0x988   : > { %v1201_v47 = vpop.f32.mrb[14].mxu1 }
 0x989   : > { %v3332_v48 = vadd.f32 %v2094_v44, %v1204_v45  ;;  %v2254_v49 = vpop.f32.mrb[15].mxu1  ;;  %v2113_v44 = vld [vmem:[#allocation8 + $0x1] ss:$0 sm:$0xff] }
 0x98b   : > { %v1213_v50 = vpack.c.bf16 %v3332_v48, %v3332_v48 }
 0x98d   : > { %2260 = vmatmul.mubr.msk.bf16.vlgmr.msra.gmra.mrb[16].mxu0 %vm684_vm1, %v1213_v50 }
 0x98e   : > { %2265 = vmatprep.mubr.msk.bf16.mxu0 %vm2825_vm0, %v2824_v1 }
 0xa60   : > { %v1268_v51 = vpop.f32.mrb[16].mxu0 }
 0xa61   : > { %v1274_v52 = vpack.c.bf16 %v1268_v51, %v1268_v51  ;;  %v2261_v53 = vpop.f32.mrb[17].mxu0 }
 0xa62   : > { %v1271_v54 = vpop.f32.mrb[18].mxu0 }
 0xa63   : > { %1386 = vrot.lane.b32.xlu1 %v1274_v52, %s2828_s0  ;;  %1276 = vrot.lane.b32.xlu0 %v1274_v52, %s2827_s14  ;;  %v2262_v55 = vpop.f32.mrb[19].mxu0  ;;  %s3543_s14 = sld [smem:[#allocation29_spill]] }
 0xa67   : > { %1384 = vrot.lane.b32.xlu0 %v1274_v52, %s2826_s19  ;;  %s3540_s19 = smov 48  }
 0xad5   : > { %v1277_v56 = vpop.permute.xlu0 %1276  ;;  %v1387_v58 = vpop.permute.xlu1 %1386 }
 0xad6   : > { %v1282_v57 = vsel %vm732_vm2, %v1277_v56, 0  ;;  %v1392_v59 = vsel %vm732_vm2, %v1387_v58, 0 }
 0xad7   : > { %2264 = vmatpush3.bf16.xpose.msra.mxu0 %v1282_v57  ;;  %v2466_v57 = vld [vmem:[%s3488_s7 + $0x10] sm:$0xff]  }
 0xad8   : > { %2275 = vmatprep.subr.bf16.mxu0 %v2824_v1 }
 0xad9   : > { %v1385_v60 = vpop.permute.xlu0 %1384 }
 0xade   : > { %2266 = vmatmul.mubr.msk.bf16.vlgmr.msra.gmra.mrb[20].mxu0 %vm732_vm2, %v1274_v52 }
 0xadf   : > { %2276 = vmatpush3.bf16.xpose.msra.mxu0 %v1392_v59  ;;  %2277 = vmatprep.mubr.msk.bf16.mxu0 %vm2825_vm0, %v2824_v1 }
 0xae0   : > { %2287 = vmatprep.subr.bf16.mxu0 %v2824_v1 }
 0xae6   : > { %2278 = vmatmul.mubr.msk.bf16.vlgmr.msra.gmra.mrb[24].mxu0 %vm732_vm2, %v1385_v60 }
 0xae7   : > { %2291 = vmatprep.mubr.msk.bf16.mxu0 %vm2825_vm0, %v2824_v1  ;;  %2288 = vmatpush3.bf16.msra.mxu0 %v2464_v30 }
 0xae8   : > { %2289 = vmatprep.subr.bf16.mxu0 %v2824_v1 }
 0xaeb   : > { %2290 = vmatpush3.bf16.msra.mxu0 %v2465_v31 }
 0xaec   : > { %2303 = vmatprep.subr.bf16.mxu0 %v2824_v1 }
 0xbb1   : > { %v1318_v61 = vpop.f32.mrb[20].mxu0 }
 0xbb2   : > { %v2267_v62 = vpop.f32.mrb[21].mxu0  ;;  %v1324_v63 = vsel %vm779_vm3, %v1318_v61, -inf }
 0xbb3   : > { %1325 = vmax.xlane.f32.xlu1 %v1324_v63  ;;  %v1321_v0 = vpop.f32.mrb[22].mxu0  ;;  %v2114_v62 = vld [vmem:[#allocation9 + $0x1] ss:$0 sm:$0xff] }
 0xbb4   : > { %v2268_v2 = vpop.f32.mrb[23].mxu0  ;;  %v2115_v0 = vld [vmem:[#allocation11 + $0x1] ss:$0 sm:$0xff] }
 0xbb9   : > { %v1428_v3 = vpop.f32.mrb[24].mxu0 }
 0xbba   : > { %v2279_v4 = vpop.f32.mrb[25].mxu0  ;;  %v1434_v5 = vsel %vm779_vm3, %v1428_v3, -inf }
 0xbbb   : > { %1435 = vmax.xlane.f32.xlu0 %v1434_v5  ;;  %v1431_v7 = vpop.f32.mrb[26].mxu0  ;;  %v2468_v5 = vld [vmem:[%s3539_s13 + $0x20] sm:$0xff]  }
 0xbbc   : > { %v2280_v8 = vpop.f32.mrb[27].mxu0  ;;  %v2469_v7 = vld [vmem:[%s3539_s13 + $0x28] sm:$0xff]  }
 0xbbd   : > { %v2470_v8 = vld [vmem:[%s3539_s13 + $0x30] sm:$0xff]  }
 0xc40   : > { %v1326_v9 = vpop.xlane.xlu1 %1325 }
 0xc41   : > { %v1327_v10 = vsub.f32 %v1318_v61, %v1326_v9  ;;  %v2471_v9 = vld [vmem:[%s3539_s13 + $0x38] sm:$0xff]  }
 0xc43   : > { %v1328_v11 = vmul.f32 1.442695, %v1327_v10  ;;  %v2120_v10 = vld [vmem:[#allocation12 + $0x1] ss:$0 sm:$0xff] }
 0xc45   : > { %2486 = vpow2.f32 %v1328_v11 }
 0xc48   : > { %v1436_v12 = vpop.xlane.xlu0 %1435 }
 0xc49   : > { %v1437_v13 = vsub.f32 %v1428_v3, %v1436_v12 }
 0xc4b   : > { %v1438_v6 = vmul.f32 1.442695, %v1437_v13 }
 0xc4d   : > { %2488 = vpow2.f32 %v1438_v6 }
 0xc4f   : > { %v2487_v14 = vpop.eup %2486 }
 0xc50   : > { %v1330_v15 = vsel %vm779_vm3, %v2487_v14, 0.0 }
 0xc51   : > { %1331 = vadd.xlane.f32.xlu0 %v1330_v15 }
 0xc57   : > { %v2489_v16 = vpop.eup %2488 }
 0xc58   : > { %v1440_v17 = vsel %vm779_vm3, %v2489_v16, 0.0 }
 0xc59   : > { %1441 = vadd.xlane.f32.xlu1 %v1440_v17 }
 0xc67   : > { %1336 = vrot.lane.b32.xlu0 %v1274_v52, %s2829_s23 }
 0xc6a   : > { %1446 = vrot.lane.b32.xlu1 %v1274_v52, %s3540_s19  ;;  %s662_s19 = scalar_lea.vmem [#allocation17], %s3199_s22 }
 0xcde   : > { %v1332_v18 = vpop.xlane.xlu0 %1331 }
 0xcdf   : > { %2490 = vrcp.f32 %v1332_v18 }
 0xce2   : > { %v1337_v19 = vpop.permute.xlu0 %1336 }
 0xce3   : > { %v1342_v20 = vsel %vm797_vm4, %v1337_v19, 0 }
 0xce4   : > { %2270 = vmatpush3.bf16.msra.mxu1 %v1342_v20 }
 0xce5   : > { %2281 = vmatprep.subr.bf16.mxu1 %v2824_v1 }
 0xce6   : > { %v1442_v21 = vpop.xlane.xlu1 %1441 }
 0xce7   : > { %2492 = vrcp.f32 %v1442_v21 }
 0xce9   : > { %v2491_v22 = vpop.eup %2490 }
 0xcea   : > { %v1334_v23 = vmul.f32 %v2491_v22, %v2487_v14  ;;  %v1447_v24 = vpop.permute.xlu1 %1446  ;;  %v2137_v22 = vld [vmem:[#allocation14 + $0x1] ss:$0 sm:$0xff] }
 0xceb   : > { %v1452_v26 = vsel %vm797_vm4, %v1447_v24, 0 }
 0xcec   : > { %v1335_v25 = vpack.c.bf16 %v1334_v23, %v1334_v23 }
 0xcee   : > { %2272 = vmatmul.mubr.msk.bf16.vlgmr.msra.gmra.mrb[16].mxu1 %vm779_vm3, %v1335_v25 }
 0xcef   : > { %2282 = vmatpush3.bf16.msra.mxu1 %v1452_v26  ;;  %2283 = vmatprep.mubr.msk.bf16.mxu1 %vm2825_vm0, %v2824_v1 }
 0xcf0   : > { %2295 = vmatprep.subr.bf16.mxu1 %v2824_v1 }
 0xcf1   : > { %v2493_v27 = vpop.eup %2492 }
 0xcf2   : > { %v1444_v28 = vmul.f32 %v2493_v27, %v2489_v16 }
 0xcf4   : > { %v1445_v29 = vpack.c.bf16 %v1444_v28, %v1444_v28 }
 0xcf6   : > { %2284 = vmatmul.mubr.msk.bf16.vlgmr.msra.gmra.mrb[20].mxu1 %vm779_vm3, %v1445_v29 }
 0xcf7   : > { %2299 = vmatprep.mubr.msk.bf16.mxu1 %vm2825_vm0, %v2824_v1  ;;  %2296 = vmatpush3.bf16.msra.mxu1 %v2466_v57 }
 0xcf8   : > { %2297 = vmatprep.subr.bf16.mxu1 %v2824_v1 }
 0xdc1   : > { %v1378_v32 = vpop.f32.mrb[16].mxu1 }
 0xdc2   : > { %v2273_v33 = vpop.f32.mrb[17].mxu1 }
 0xdc3   : > { %v1381_v34 = vpop.f32.mrb[18].mxu1 }
 0xdc4   : > { %v2274_v35 = vpop.f32.mrb[19].mxu1 }
 0xdc9   : > { %v1488_v36 = vpop.f32.mrb[20].mxu1 }
 0xdca   : > { %1495 = vrot.lane.b32.xlu1 %v1488_v36, %s3541_s11  ;;  %v2285_v37 = vpop.f32.mrb[21].mxu1  ;;  %s3546_s11 = sld [smem:[#allocation32_spill]] }
 0xdcb   : > { %v1491_v38 = vpop.f32.mrb[22].mxu1 }
 0xdcc   : > { %v2286_v39 = vpop.f32.mrb[23].mxu1  ;;  %v2138_v38 = vld [vmem:[%s3542_s18] ss:$0 sm:$0xff]  ;;  %s3545_s18 = sld [smem:[#allocation31_spill]] }
 0xdd0   : > { %s3437_s24 = scalar_lea.hbm %s3546_s11, %s2145_s9 }
 0xe3c   : > { %v1496_v40 = vpop.permute.xlu1 %1495 }
 0xe3d   : > { %v1498_v41 = vsel %vm732_vm2, %v1378_v32, %v1496_v40  ;;  %v2139_v40 = vld [vmem:[#allocation15] ss:$0 sm:$0xff] }
 0xe3e   : > { %v1499_v42 = vpack.c.bf16 %v1498_v41, %v1498_v41 }
 0xe40   : > { %2292 = vmatmul.mubr.msk.bf16.vlgmr.msra.gmra.mrb[28].mxu0 %vm684_vm1, %v1499_v42  ;;  %v2140_v42 = vld [vmem:[%s3543_s14] ss:$0 sm:$0xff]  ;;  %s1918_s14 = sshll.u32 %s662_s19, 4  ;;  %s3439_s14 = int_to_ptr.vmem [resolvable:$true] %s1918_s14 }
 0xe41   : > { %2311 = vmatprep.mubr.msk.bf16.mxu0 %vm2825_vm0, %v2824_v1  ;;  %2304 = vmatpush3.bf16.msra.mxu0 %v2468_v5  ;;  %s2730_s30 = scalar_lea.vmem %s3439_s14, 16 }
 0xe42   : > { %2305 = vmatprep.subr.bf16.mxu0 %v2824_v1  ;;  %p2731_p5 = scmp.ne.s32.totalorder %s3439_s14, %s2730_s30 }
 0xe44   : > { %p2732_p4 = pnand %p2731_p5, %p3547_p7 }
 0xe45   : > { %2306 = vmatpush3.bf16.msra.mxu0 %v2469_v7  ;;  %v2472_v7 = vld [vmem:[%s3544_s1] sm:$0xff]  }
 0xe46   : > { %2307 = vmatprep.subr.bf16.mxu0 %v2824_v1  ;;  %p2733_p1 = pneg %p2732_p4 }
 0xe49   : > { %2308 = vmatpush3.bf16.msra.mxu0 %v2470_v8  ;;  %v2473_v8 = vld [vmem:[%s3544_s1 + $0x8] sm:$0xff]  }
 0xe4a   : > { %2309 = vmatprep.subr.bf16.mxu0 %v2824_v1 }
 0xe4d   : > { %2310 = vmatpush3.bf16.msra.mxu0 %v2471_v9 }
 0xf13   : > { %v1554_v43 = vpop.f32.mrb[28].mxu0 }
 0xf14   : > { %v1560_v45 = vadd.f32 %v1554_v43, %v3332_v48  ;;  %v2293_v46 = vpop.f32.mrb[29].mxu0  ;;  %v2467_v48 = vld [vmem:[%s3488_s7 + $0x18] sm:$0xff]  }
 0xf15   : > { %v1557_v47 = vpop.f32.mrb[30].mxu0  ;;  %2298 = vmatpush3.bf16.msra.mxu1 %v2467_v48  ;;  %v2832_v46 = vmov 0  }
 0xf16   : > { %v1569_v49 = vadd.f32 %v2113_v44, %v1560_v45  ;;  %v2294_v50 = vpop.f32.mrb[31].mxu0  ;;  %2315 = vmatprep.subr.bf16.mxu1 %v2824_v1  ;;  %2451 = vset.pattern.permute.xlu0 %v2832_v46  ;;  %v2141_v47 = vld [vmem:[#allocation2] ss:$0 sm:$0xff] }
 0xf18   : > { %v1574_v51 = vsel %vm684_vm1, %v1569_v49, 0.0 }
 0xf19   : > { %1575 = vadd.xlane.f32.xlu0 %v1574_v51 }
 0xfa6   : > { %v1576_v52 = vpop.xlane.xlu0 %1575 }
 0xfa7   : > { %v1577_v53 = vmul.f32 0.03125, %v1576_v52 }
 0xfa9   : > { %v1578_v54 = vsub.f32 %v1569_v49, %v1577_v53 }
 0xfab   : > { %v1579_v55 = vmul.f32 %v1578_v54, %v1578_v54 }
 0xfad   : > { %v1580_v56 = vsel %vm684_vm1, %v1579_v55, 0.0 }
 0xfae   : > { %1581 = vadd.xlane.f32.xlu1 %v1580_v56 }
0x103b   : > { %v1582_v58 = vpop.xlane.xlu1 %1581 }
0x103c   : > { %v1583_v59 = vmul.f32 0.03125, %v1582_v58 }
0x103e   : > { %v1584_v60 = vadd.f32 1e-05, %v1583_v59 }
0x1040   : > { %2494 = vrsqrt.f32 %v1584_v60 }
0x104a   : > { %v2495_v61 = vpop.eup %2494 }
0x104b   : > { %v1586_v63 = vmul.f32 %v2495_v61, %v1578_v54 }
0x104d   : > { %v1593_v2 = vmul.f32 %v2114_v62, %v1586_v63 }
0x104f   : > { %v1600_v3 = vadd.f32 %v2115_v0, %v1593_v2 }
0x1051   : > { %v1601_v4 = vpack.c.bf16 %v1600_v3, %v1600_v3 }
0x1053   : > { %2300 = vmatmul.mubr.msk.bf16.vlgmr.msra.gmra.mrb[24].mxu1 %vm684_vm1, %v1601_v4 }
0x1054   : > { %2319 = vmatprep.mubr.msk.bf16.mxu1 %vm2825_vm0, %v2824_v1  ;;  %2316 = vmatpush3.bf16.msra.mxu1 %v2472_v7 }
0x1055   : > { %2317 = vmatprep.subr.bf16.mxu1 %v2824_v1  ;;  %v1848_v1 = vld [vmem:[%s3545_s18] sm:$0x1]  ;;  %s2734_s18 = sshll.u32 %s2833_s16, 4  ;;  %s2735_s18 = int_to_ptr.vmem [resolvable:$false] %s2734_s18 }
0x1056   : > { %s2736_s0 = scalar_lea.vmem %s2735_s18, 32  ;;  %p2737_p3 = scmp.lt.s32.totalorder %s3439_s14, %s2735_s18 }
0x1057   : > { %p2738_p9 = scmp.lt.s32.totalorder %s2736_s0, %s2730_s30 }
0x1058   : > { %2318 = vmatpush3.bf16.msra.mxu1 %v2473_v8 }
0x1059   : > { %p2739_p6 = por %p2738_p9, %p2737_p3 }
0x105b   : > { %p2740_p0 = pnand %p2739_p6, %p2733_p1 }
0x1126   : > { %v1664_v11 = vpop.f32.mrb[24].mxu1 }
0x1127   : > { %v1665_v12 = vadd.f32 %v2120_v10, %v1664_v11  ;;  %v2301_v13 = vpop.f32.mrb[25].mxu1 }
0x1128   : > { %v1667_v6 = vpop.f32.mrb[26].mxu1 }
0x1129   : > { %v1671_v14 = vmul.f32 0.70710677, %v1665_v12  ;;  %v2302_v15 = vpop.f32.mrb[27].mxu1  ;;  %v1670_v17 = vmul.f32 0.5, %v1665_v12 }
0x112b   : > { %2496 = verf.f32 %v1671_v14 }
0x1135   : > { %v2497_v16 = vpop.eup %2496 }
0x1136   : > { %v1673_v18 = vadd.f32 1.0, %v2497_v16 }
0x1138   : > { %v1674_v19 = vmul.f32 %v1673_v18, %v1670_v17 }
0x113a   : > { %v1675_v20 = vpack.c.bf16 %v1674_v19, %v1674_v19 }
0x113c   : > { %2312 = vmatmul.mubr.msk.bf16.vlgmr.msra.gmra.mrb[32].mxu0 %vm1160_vm5, %v1675_v20 }
0x120f   : > { %v1746_v21 = vpop.f32.mrb[32].mxu0 }
0x1210   : > { %v1752_v23 = vadd.f32 %v1746_v21, %v1569_v49  ;;  %v2313_v24 = vpop.f32.mrb[33].mxu0 }
0x1211   : > { %v1749_v25 = vpop.f32.mrb[34].mxu0 }
0x1212   : > { %v2314_v26 = vpop.f32.mrb[35].mxu0  ;;  %v1761_v27 = vadd.f32 %v2137_v22, %v1752_v23 }
0x1214   : > { %v1764_v28 = vsel %vm684_vm1, %v1761_v27, 0.0 }
0x1215   : > { %1765 = vadd.xlane.f32.xlu0 %v1764_v28 }
0x12a2   : > { %v1766_v29 = vpop.xlane.xlu0 %1765 }
0x12a3   : > { %v1767_v30 = vmul.f32 0.03125, %v1766_v29 }
0x12a5   : > { %v1768_v31 = vsub.f32 %v1761_v27, %v1767_v30 }
0x12a7   : > { %v1769_v32 = vmul.f32 %v1768_v31, %v1768_v31 }
0x12a9   : > { %v1770_v33 = vsel %vm684_vm1, %v1769_v32, 0.0 }
0x12aa   : > { %1771 = vadd.xlane.f32.xlu0 %v1770_v33 }
0x1337   : > { %v1772_v34 = vpop.xlane.xlu0 %1771 }
0x1338   : > { %v1773_v35 = vmul.f32 0.03125, %v1772_v34 }
0x133a   : > { %v1774_v36 = vadd.f32 1e-05, %v1773_v35 }
0x133c   : > { %2498 = vrsqrt.f32 %v1774_v36 }
0x1346   : > { %v2499_v37 = vpop.eup %2498 }
0x1347   : > { %v1776_v39 = vmul.f32 %v2499_v37, %v1768_v31 }
0x1349   : > { %v1783_v41 = vmul.f32 %v2138_v38, %v1776_v39 }
0x134b   : > { %v1790_v43 = vadd.f32 %v2139_v40, %v1783_v41 }
0x134d   : > { %v1798_v44 = vmul.f32 %v2140_v42, %v1790_v43 }
0x134f   : > { %v1799_v45 = vsel %vm684_vm1, %v1798_v44, 0.0 }
0x1350   : > { %1800 = vadd.xlane.f32.xlu1 %v1799_v45 }
0x13dd   : > { %v1801_v49 = vpop.xlane.xlu1 %1800 }
0x13de   : > { %v1809_v50 = vadd.f32 %v2141_v47, %v1801_v49 }
0x13e0   : > { %v1811_v51 = vsel %vm1810_vm6, %v1809_v50, -inf }
0x13e1   : > { %v1812_v52 = vrot.slane %v1811_v51, 4 }
0x13e3   : > { %v1813_v53 = vmax.f32 %v1811_v51, %v1812_v52 }
0x13e5   : > { %v1814_v54 = vrot.slane %v1813_v53, 2 }
0x13e7   : > { %v1815_v55 = vmax.f32 %v1813_v53, %v1814_v54 }
0x13e9   : > { %v1816_v56 = vrot.slane %v1815_v55, 1 }
0x13eb   : > { %v1817_v57 = vmax.f32 %v1815_v55, %v1816_v56 }
0x13ed   : > { %v1818_v48 = vsub.f32 %v1809_v50, %v1817_v57 }
0x13ef   : > { %v1819_v58 = vmul.f32 1.442695, %v1818_v48 }
0x13f1   : > { %2500 = vpow2.f32 %v1819_v58 }
0x13fb   : > { %v2501_v59 = vpop.eup %2500 }
0x13fc   : > { %v1821_v60 = vsel %vm1810_vm6, %v2501_v59, 0.0 }
0x13fd   : > { %v1822_v61 = vrot.slane %v1821_v60, 4 }
0x13ff   : > { %v1823_v62 = vadd.f32 %v1822_v61, %v1821_v60 }
0x1401   : > { %v1824_v63 = vrot.slane %v1823_v62, 2 }
0x1403   : > { %v1825_v0 = vadd.f32 %v1824_v63, %v1823_v62 }
0x1405   : > { %v1826_v2 = vrot.slane %v1825_v0, 1 }
0x1407   : > { %v1827_v3 = vadd.f32 %v1826_v2, %v1825_v0 }
0x1409   : > { %2502 = vrcp.f32 %v1827_v3 }
0x1413   : > { %v2503_v4 = vpop.eup %2502 }
0x1414   : > { %v1829_v5 = vmul.f32 %v2503_v4, %v2501_v59 }
0x1416   : > { %1832 = vperm.xlu0 %2451, %v1829_v5  }
0x1495   : > { %v1833_v9 = vpop.permute.xlu0 %1832 }
0x1496   : > { %v1835_v10 = vmul.f32 %v1833_v9, %v1790_v43 }
0x1498   : > { %v1836_v11 = vsel %vm684_vm1, %v1835_v10, 0.0 }
0x1499   : > { %v1837_v12 = vrot.slane %v1836_v11, 4 }
0x149b   : > { %v1838_v13 = vadd.f32 %v1837_v12, %v1836_v11 }
0x149d   : > { %v1839_v6 = vrot.slane %v1838_v13, 2 }
0x149f   : > { %v1840_v14 = vadd.f32 %v1839_v6, %v1838_v13 }
0x14a1   : > { %v1841_v15 = vrot.slane %v1840_v14, 1 }
0x14a3   : > { %v1842_v16 = vadd.f32 %v1841_v15, %v1840_v14 }
0x14a5   : > { %v1843_v17 = vpack.c.bf16 %v1842_v16, %v1842_v16 }
0x14a7   : > { %2320 = vmatmul.mubr.msk.bf16.vlgmr.msra.gmra.mrb[28].mxu1 %vm684_vm1, %v1843_v17 }
0x157a   : > { %v1898_v18 = vpop.f32.mrb[28].mxu1 }
0x157b   : > { %v1899_v19 = vadd.f32 %v1898_v18, %v1848_v1  ;;  %v2321_v20 = vpop.f32.mrb[29].mxu1 }
0x157c   : > { %v1901_v21 = vpop.f32.mrb[30].mxu1 }
0x157d   : > { %1904 = vst [vmem:[%s662_s19] sm:$0x1] %v1899_v19  ;;  %v2322_v22 = vpop.f32.mrb[31].mxu1 }
0x157e   : > { %2743 = shalt.err (!%p2740_p0)
}
0x157f   : > { %s2744_s22 = scalar_lea.hbm %s3437_s24, 16  ;;  %s2748_s23 = scalar_lea.hbm %s3546_s11, 32 }
0x1580   : > { %p2745_p2 = scmp.ne.s32.totalorder %s3437_s24, %s2744_s22  ;;  %p2749_p12 = scmp.lt.u32.totalorder %s3437_s24, %s3546_s11 }
0x1581   : > { %p2750_p11 = scmp.lt.u32.totalorder %s2748_s23, %s2744_s22  ;;  %p2752_p5 = scmp.lt.u32.totalorder %s2744_s22, %s3437_s24 }
0x1582   : > { %p2746_p8 = pnand %p2745_p2, %p3547_p7 }
0x1583   : > { %p2751_p13 = por %p2750_p11, %p2749_p12 }
0x1584   : > { %p2747_p10 = pneg %p2746_p8 }
0x1585   : > { %p2753_p4 = por %p2752_p5, %p2751_p13 }
0x1587   : > { %p2754_p1 = pnand %p2753_p4, %p2747_p10 }
0x1589   : > { %2757 = shalt.err (!%p2754_p1)
}
0x158a   : > { %2353 = dma.vmem_to_hbm [thread:$0]  (%p3547_p7), %s3439_s14, 16, %s3437_s24, %s1906_s25  }
0x158b PF: > { %s1930_s30 = sand.u32 1, %s2800_s26   ;;  %p3548_p3 = scmp.ne.s32.totalorder %s3527_s21, 0 }
0x158c   : > { %p3549_p9 = scmp.ge.s32.totalorder %s2812_s29, 2  ;;  %s1931_s0 = scalar_lea.sflag [#allocation5], %s1930_s30 }
0x158e   : > { %p2382_p6 = pnand %p3549_p9, %p3548_p3 }
0x1590   : > { %2795 = dma.done.wait (!%p2382_p6), %s1931_s0, 16  }
0x1591   : > { %2797 = vsyncadd (!%p2382_p6), %s1931_s0, 4294967280  ;;  %p36_p0 = scmp.ge.s32.totalorder %s3129_s20, 4   ;;  %s3550_s26 = smov %s2804_s27 }
0x1592   : > { %s3551_s27 = smov %s2808_s28  ;;  %s3552_s28 = smov %s3141_s5 }
0x1593   : > { %s3553_s29 = smov %s3129_s20  ;;  %38 = sbr.rel (!%p36_p0) target bundleno = 19 (0x13), region = 170 }
0x159a   :  { %1935 = vsyncpa [#allocation4], 1 }
0x159b   :  { %1937 = vsyncpa [#allocation4 + $0x1], 1 }
0x159c   :  { %1938 = vsyncpa [#allocation7], 1 }
0x159d   :  { %1939 = vsyncpa [#allocation10], 1 }
0x159e   :  { %1940 = vsyncpa [#allocation13], 1 }
0x159f   :  { %1941 = vsyncpa [#allocation16], 1 }
0x15a0   :  { %1942 = vsyncpa [#allocation5], 1 }
0x15a1   :  { %1944 = vsyncpa [#allocation5 + $0x1], 1 }

</bundles_post_ra>
